<compile_context>
chip_gen: v7x
topology: tpu7x:2x2x1
jax: 0.10.0
libtpu: 0.0.40
codegen_flags: <defaults>
</compile_context>

<pallas_src>
import jax
import jax.numpy as jnp
from jax.experimental import pallas as pl
from jax.experimental.pallas import tpu as pltpu

KH = KW = 3      # 3x3 conv stem
LANES = 128      # TPU lane width


def _l2_normalize(v, eps=1e-24):
    nsq = jnp.sum(v * v, axis=-1, keepdims=True)
    return v * jax.lax.rsqrt(jnp.maximum(nsq, eps))


def rep_model_forward(x_nchw, conv_w, conv_b, centroids, *, tile_h=8):
    """REPModel forward: stand-in conv backbone + cosine-similarity head."""
    B, Cin, H, W = x_nchw.shape
    kh_, kw_, cin_w, fea_dim = conv_w.shape
    assert (kh_, kw_, cin_w) == (KH, KW, Cin), (conv_w.shape, x_nchw.shape)
    n_classes = centroids.shape[0]

    th = tile_h if H % tile_h == 0 else H            # output rows per grid step
    n_row_tiles = H // th
    n_pad = max(LANES, ((n_classes + LANES - 1) // LANES) * LANES)
    kf = KH * KW * Cin                               # folded contraction dim
    inv_hw = 1.0 / float(H * W)

    # ---- wrapper-side preprocessing (one-time / input-independent) ---------
    x_nhwc = jnp.transpose(x_nchw, (0, 2, 3, 1)).astype(jnp.bfloat16)
    w_folded = conv_w.reshape(kf, fea_dim).astype(jnp.bfloat16)   # (kh,kw,c)-major
    bias = conv_b.reshape(1, fea_dim).astype(jnp.float32)
    cent_n = _l2_normalize(centroids.astype(jnp.float32))         # hoisted
    cent_pad = jnp.zeros((n_pad, fea_dim), jnp.float32).at[:n_classes].set(cent_n)
    cent_t = cent_pad.T.astype(jnp.bfloat16)                      # [fea_dim, n_pad]

    def kernel(x_ref, w_ref, b_ref, cent_ref, out_ref, xpad_ref, acc_ref):
        r = pl.program_id(1)

        # First row-tile of this image: build the zero-padded image in VMEM
        # (fused SAME padding) and clear the GAP accumulator.
        @pl.when(r == 0)
        def _():
            acc_ref[...] = jnp.zeros_like(acc_ref)
            x32 = x_ref[0].astype(jnp.float32)                    # [H, W, Cin]
            zw = jnp.zeros((H, 1, Cin), jnp.float32)
            body = jnp.concatenate([zw, x32, zw], axis=1)         # [H, W+2, Cin]
            zh = jnp.zeros((1, W + 2, Cin), jnp.float32)
            xpad_ref[...] = jnp.concatenate([zh, body, zh], axis=0)

        # Conv over this row tile: one K = KH*KW*Cin matmul on the MXU (bf16
        # operands, f32 accumulation), then bias + ReLU + row-sum on the VPU.
        row0 = pl.multiple_of(r * th, th)
        win = xpad_ref[pl.ds(row0, th + 2), :, :]                 # [th+2, W+2, Cin]
        slabs = []
        for dh in range(KH):
            for dw in range(KW):
                slab = win[dh:dh + th, dw:dw + W, :]              # [th, W, Cin]
                slabs.append(slab.reshape(th * W, Cin))
        patch = jnp.concatenate(slabs, axis=-1)                   # [th*W, kf]
        conv = jax.lax.dot_general(
            patch.astype(jnp.bfloat16), w_ref[...],
            dimension_numbers=(((1,), (0,)), ((), ())),
            preferred_element_type=jnp.float32)                   # [th*W, fea_dim]
        act = jnp.maximum(conv + b_ref[...], 0.0)                 # bias + ReLU (f32)
        acc_ref[...] += jnp.sum(act, axis=0, keepdims=True)       # GAP partial sum

        # Last row-tile: finish GAP, L2-normalize, cosine-similarity head.
        @pl.when(r == pl.num_programs(1) - 1)
        def _():
            fea = acc_ref[...] * inv_hw                           # [1, fea_dim]
            fea_n = _l2_normalize(fea).astype(jnp.bfloat16)
            out_ref[0] = jax.lax.dot_general(
                fea_n, cent_ref[...],
                dimension_numbers=(((1,), (0,)), ((), ())),
                preferred_element_type=jnp.float32)               # [1, n_pad]

    out = pl.pallas_call(
        kernel,
        out_shape=jax.ShapeDtypeStruct((B, 1, n_pad), jnp.float32),
        grid_spec=pltpu.PrefetchScalarGridSpec(
            num_scalar_prefetch=0,
            grid=(B, n_row_tiles),
            in_specs=[
                pl.BlockSpec((1, H, W, Cin), lambda b, r: (b, 0, 0, 0)),
                pl.BlockSpec((kf, fea_dim), lambda b, r: (0, 0)),
                pl.BlockSpec((1, fea_dim), lambda b, r: (0, 0)),
                pl.BlockSpec((fea_dim, n_pad), lambda b, r: (0, 0)),
            ],
            out_specs=pl.BlockSpec((1, 1, n_pad), lambda b, r: (b, 0, 0)),
            scratch_shapes=[
                pltpu.VMEM((H + 2, W + 2, Cin), jnp.float32),   # fused-padded image
                pltpu.VMEM((1, fea_dim), jnp.float32),          # GAP accumulator
            ]),
        compiler_params=pltpu.CompilerParams(
            dimension_semantics=("parallel", "arbitrary"),
            vmem_limit_bytes=32 * 1024 * 1024),
    )(x_nhwc, w_folded, bias, cent_t)

    return out[:, 0, :n_classes]


def ref_forward(x_nchw, conv_w, conv_b, centroids):
    """Pure-JAX reference mirroring the kernel's bf16 quantization points."""
    f32 = jnp.float32
    xq = x_nchw.astype(jnp.bfloat16).astype(f32)
    wq = conv_w.astype(jnp.bfloat16).astype(f32)
    x = jnp.transpose(xq, (0, 2, 3, 1))
    y = jax.lax.conv_general_dilated(
        x, wq, window_strides=(1, 1), padding="SAME",
        dimension_numbers=("NHWC", "HWIO", "NHWC"))
    y = jnp.maximum(y + conv_b.astype(f32), 0.0)
    fea = jnp.mean(y, axis=(1, 2))
    fn = _l2_normalize(fea).astype(jnp.bfloat16).astype(f32)
    cn = _l2_normalize(centroids.astype(f32)).astype(jnp.bfloat16).astype(f32)
    return fn @ cn.T


if __name__ == "__main__":
    # Small shapes consistent with the forward: B=2, Cin=4, H=W=16,
    # fea_dim=32, n_classes=8.
    B, Cin, H, W = 2, 4, 16, 16
    FEA_DIM, N_CLASSES = 32, 8

    key = jax.random.PRNGKey(0)
    kx, kwt, kb, kc = jax.random.split(key, 4)
    x = jax.random.normal(kx, (B, Cin, H, W), jnp.float32)            # NCHW like PyTorch
    conv_w = jax.random.normal(kwt, (KH, KW, Cin, FEA_DIM), jnp.float32) * 0.1
    conv_b = jax.random.normal(kb, (FEA_DIM,), jnp.float32) * 0.1
    centroids = jax.random.normal(kc, (N_CLASSES, FEA_DIM), jnp.float32)

    logits = jax.block_until_ready(rep_model_forward(x, conv_w, conv_b, centroids))
    expected = jax.block_until_ready(ref_forward(x, conv_w, conv_b, centroids))

    assert logits.shape == (B, N_CLASSES), logits.shape
    max_err = float(jnp.max(jnp.abs(logits - expected)))
    assert jnp.allclose(logits, expected, rtol=2e-3, atol=2e-3), max_err
    print("KERNEL_OK")
</pallas_src>

<mosaic_0001>
module attributes {stable_mosaic.version = 11 : i64} {
  func.func @kernel(%arg0: i32, %arg1: i32, %arg2: memref<1x16x16x4xbf16, #tpu.memory_space<vmem>>, %arg3: memref<36x32xbf16, #tpu.memory_space<vmem>>, %arg4: memref<1x32xf32, #tpu.memory_space<vmem>>, %arg5: memref<32x128xbf16, #tpu.memory_space<vmem>>, %arg6: memref<1x1x128xf32, #tpu.memory_space<vmem>>, %arg7: memref<18x18x4xf32, #tpu.memory_space<vmem>>, %arg8: memref<1x32xf32, #tpu.memory_space<vmem>>) attributes {dimension_semantics = [#tpu.dimension_semantics<parallel>, #tpu.dimension_semantics<arbitrary>], iteration_bounds = array<i64: 2, 2>, scalar_prefetch = 0 : i64, scratch_operands = 2 : i64, tpu.core_type = #tpu.core_type<tc>, window_params = [{transform_indices = @transform_0, window_bounds = array<i64: 1, 16, 16, 4>}, {pipeline_mode = #tpu.pipeline_mode<synchronous>, transform_indices = @transform_1, window_bounds = array<i64: 36, 32>}, {pipeline_mode = #tpu.pipeline_mode<synchronous>, transform_indices = @transform_2, window_bounds = array<i64: 1, 32>}, {pipeline_mode = #tpu.pipeline_mode<synchronous>, transform_indices = @transform_3, window_bounds = array<i64: 32, 128>}, {transform_indices = @transform_4, window_bounds = array<i64: 1, 1, 128>}]} {
    %c0_i32 = arith.constant 0 : i32
    %0 = arith.cmpi eq, %arg1, %c0_i32 : i32
    %1 = arith.extui %0 : i1 to i32
    %c0_i32_0 = arith.constant 0 : i32
    %2 = arith.cmpi ne, %1, %c0_i32_0 : i32
    scf.if %2 {
      %cst_13 = arith.constant 0.000000e+00 : f32
      %42 = vector.broadcast %cst_13 : f32 to vector<1x32xf32>
      %c0_14 = arith.constant 0 : index
      %c0_15 = arith.constant 0 : index
      %43 = vector.load %arg8[%c0_14, %c0_15] : memref<1x32xf32, #tpu.memory_space<vmem>>, vector<1x32xf32>
      tpu.vector_store %arg8[%c0_14, %c0_15], %42 {strides = array<i32>} : memref<1x32xf32, #tpu.memory_space<vmem>>, vector<1x32xf32>,
      %c0_16 = arith.constant 0 : index
      %c0_17 = arith.constant 0 : index
      %c0_18 = arith.constant 0 : index
      %c0_19 = arith.constant 0 : index
      %44 = vector.load %arg2[%c0_16, %c0_17, %c0_18, %c0_19] : memref<1x16x16x4xbf16, #tpu.memory_space<vmem>>, vector<1x16x16x4xbf16>
      %45 = vector.shape_cast %44 : vector<1x16x16x4xbf16> to vector<16x16x4xbf16>
      %46 = arith.extf %45 : vector<16x16x4xbf16> to vector<16x16x4xf32>
      %cst_20 = arith.constant 0.000000e+00 : f32
      %47 = vector.broadcast %cst_20 : f32 to vector<16x1x4xf32>
      %48 = tpu.concatenate %47, %46, %47 in 1 : vector<16x1x4xf32>, vector<16x16x4xf32>, vector<16x1x4xf32> -> vector<16x18x4xf32>
      %cst_21 = arith.constant 0.000000e+00 : f32
      %49 = vector.broadcast %cst_21 : f32 to vector<1x18x4xf32>
      %50 = tpu.concatenate %49, %48, %49 in 0 : vector<1x18x4xf32>, vector<16x18x4xf32>, vector<1x18x4xf32> -> vector<18x18x4xf32>
      %c0_22 = arith.constant 0 : index
      %c0_23 = arith.constant 0 : index
      %c0_24 = arith.constant 0 : index
      %51 = vector.load %arg7[%c0_22, %c0_23, %c0_24] : memref<18x18x4xf32, #tpu.memory_space<vmem>>, vector<18x18x4xf32>
      tpu.vector_store %arg7[%c0_22, %c0_23, %c0_24], %50 {strides = array<i32>} : memref<18x18x4xf32, #tpu.memory_space<vmem>>, vector<18x18x4xf32>,
    } else {
    }
    %c8_i32 = arith.constant 8 : i32
    %3 = arith.muli %arg1, %c8_i32 : i32
    %4 = tpu.assume_multiple %3, 8 : i32
    %5 = arith.index_cast %4 : i32 to index
    %c0 = arith.constant 0 : index
    %c0_1 = arith.constant 0 : index
    %6 = vector.load %arg7[%5, %c0, %c0_1] : memref<18x18x4xf32, #tpu.memory_space<vmem>>, vector<10x18x4xf32>
    %7 = vector.extract_strided_slice %6 {offsets = [0, 0, 0], sizes = [8, 16, 4], strides = [1, 1, 1]} : vector<10x18x4xf32> to vector<8x16x4xf32>
    %8 = vector.shape_cast %7 : vector<8x16x4xf32> to vector<128x4xf32>
    %9 = vector.extract_strided_slice %6 {offsets = [0, 1, 0], sizes = [8, 16, 4], strides = [1, 1, 1]} : vector<10x18x4xf32> to vector<8x16x4xf32>
    %10 = vector.shape_cast %9 : vector<8x16x4xf32> to vector<128x4xf32>
    %11 = vector.extract_strided_slice %6 {offsets = [0, 2, 0], sizes = [8, 16, 4], strides = [1, 1, 1]} : vector<10x18x4xf32> to vector<8x16x4xf32>
    %12 = vector.shape_cast %11 : vector<8x16x4xf32> to vector<128x4xf32>
    %13 = vector.extract_strided_slice %6 {offsets = [1, 0, 0], sizes = [8, 16, 4], strides = [1, 1, 1]} : vector<10x18x4xf32> to vector<8x16x4xf32>
    %14 = vector.shape_cast %13 : vector<8x16x4xf32> to vector<128x4xf32>
    %15 = vector.extract_strided_slice %6 {offsets = [1, 1, 0], sizes = [8, 16, 4], strides = [1, 1, 1]} : vector<10x18x4xf32> to vector<8x16x4xf32>
    %16 = vector.shape_cast %15 : vector<8x16x4xf32> to vector<128x4xf32>
    %17 = vector.extract_strided_slice %6 {offsets = [1, 2, 0], sizes = [8, 16, 4], strides = [1, 1, 1]} : vector<10x18x4xf32> to vector<8x16x4xf32>
    %18 = vector.shape_cast %17 : vector<8x16x4xf32> to vector<128x4xf32>
    %19 = vector.extract_strided_slice %6 {offsets = [2, 0, 0], sizes = [8, 16, 4], strides = [1, 1, 1]} : vector<10x18x4xf32> to vector<8x16x4xf32>
    %20 = vector.shape_cast %19 : vector<8x16x4xf32> to vector<128x4xf32>
    %21 = vector.extract_strided_slice %6 {offsets = [2, 1, 0], sizes = [8, 16, 4], strides = [1, 1, 1]} : vector<10x18x4xf32> to vector<8x16x4xf32>
    %22 = vector.shape_cast %21 : vector<8x16x4xf32> to vector<128x4xf32>
    %23 = vector.extract_strided_slice %6 {offsets = [2, 2, 0], sizes = [8, 16, 4], strides = [1, 1, 1]} : vector<10x18x4xf32> to vector<8x16x4xf32>
    %24 = vector.shape_cast %23 : vector<8x16x4xf32> to vector<128x4xf32>
    %25 = tpu.concatenate %8, %10, %12, %14, %16, %18, %20, %22, %24 in 1 : vector<128x4xf32>, vector<128x4xf32>, vector<128x4xf32>, vector<128x4xf32>, vector<128x4xf32>, vector<128x4xf32>, vector<128x4xf32>, vector<128x4xf32>, vector<128x4xf32> -> vector<128x36xf32>
    %26 = arith.truncf %25 : vector<128x36xf32> to vector<128x36xbf16>
    %c0_2 = arith.constant 0 : index
    %c0_3 = arith.constant 0 : index
    %27 = vector.load %arg3[%c0_2, %c0_3] : memref<36x32xbf16, #tpu.memory_space<vmem>>, vector<36x32xbf16>
    %cst = arith.constant dense<0.000000e+00> : vector<128x32xf32>
    %28 = tpu.matmul %26, %27, %cst {dimension_numbers = #tpu.dot_dimension_numbers<[1], [0], [0], [1], [0, 0, 1, 1], [], []>} : vector<128x36xbf16>, vector<36x32xbf16>, vector<128x32xf32> -> vector<128x32xf32>
    %c0_4 = arith.constant 0 : index
    %c0_5 = arith.constant 0 : index
    %29 = vector.load %arg4[%c0_4, %c0_5] : memref<1x32xf32, #tpu.memory_space<vmem>>, vector<1x32xf32>
    %30 = vector.broadcast %29 : vector<1x32xf32> to vector<128x32xf32>
    %31 = arith.addf %28, %30 : vector<128x32xf32>
    %cst_6 = arith.constant 0.000000e+00 : f32
    %32 = vector.broadcast %cst_6 : f32 to vector<128x32xf32>
    %33 = arith.maximumf %31, %32 : vector<128x32xf32>
    %c0_7 = arith.constant 0 : index
    %c0_8 = arith.constant 0 : index
    %34 = vector.load %arg8[%c0_7, %c0_8] : memref<1x32xf32, #tpu.memory_space<vmem>>, vector<1x32xf32>
    %cst_9 = arith.constant dense<0.000000e+00> : vector<32xf32>
    %35 = vector.multi_reduction <add>, %33, %cst_9 [0] : vector<128x32xf32> to vector<32xf32>
    %36 = vector.shape_cast %35 : vector<32xf32> to vector<1x32xf32>
    %37 = arith.addf %34, %36 : vector<1x32xf32>
    %c0_10 = arith.constant 0 : index
    %c0_11 = arith.constant 0 : index
    %38 = vector.load %arg8[%c0_10, %c0_11] : memref<1x32xf32, #tpu.memory_space<vmem>>, vector<1x32xf32>
    tpu.vector_store %arg8[%c0_10, %c0_11], %37 {strides = array<i32>} : memref<1x32xf32, #tpu.memory_space<vmem>>, vector<1x32xf32>,
    %c1_i32 = arith.constant 1 : i32
    %39 = arith.cmpi eq, %arg1, %c1_i32 : i32
    %40 = arith.extui %39 : i1 to i32
    %c0_i32_12 = arith.constant 0 : i32
    %41 = arith.cmpi ne, %40, %c0_i32_12 : i32
    scf.if %41 {
      %c0_13 = arith.constant 0 : index
      %c0_14 = arith.constant 0 : index
      %42 = vector.load %arg8[%c0_13, %c0_14] : memref<1x32xf32, #tpu.memory_space<vmem>>, vector<1x32xf32>
      %cst_15 = arith.constant 3.906250e-03 : f32
      %43 = vector.broadcast %cst_15 : f32 to vector<1x32xf32>
      %44 = arith.mulf %42, %43 : vector<1x32xf32>
      %45 = arith.mulf %44, %44 : vector<1x32xf32>
      %cst_16 = arith.constant dense<0.000000e+00> : vector<1xf32>
      %46 = vector.multi_reduction <add>, %45, %cst_16 [1] : vector<1x32xf32> to vector<1xf32>
      %47 = vector.shape_cast %46 : vector<1xf32> to vector<1x1xf32>
      %cst_17 = arith.constant 1.000000e-24 : f32
      %48 = vector.broadcast %cst_17 : f32 to vector<1x1xf32>
      %49 = arith.maximumf %47, %48 : vector<1x1xf32>
      %50 = math.rsqrt %49 : vector<1x1xf32>
      %51 = vector.broadcast %50 : vector<1x1xf32> to vector<1x32xf32>
      %52 = arith.mulf %44, %51 : vector<1x32xf32>
      %53 = arith.truncf %52 : vector<1x32xf32> to vector<1x32xbf16>
      %c0_18 = arith.constant 0 : index
      %c0_19 = arith.constant 0 : index
      %54 = vector.load %arg5[%c0_18, %c0_19] : memref<32x128xbf16, #tpu.memory_space<vmem>>, vector<32x128xbf16>
      %cst_20 = arith.constant dense<0.000000e+00> : vector<1x128xf32>
      %55 = tpu.matmul %53, %54, %cst_20 {dimension_numbers = #tpu.dot_dimension_numbers<[1], [0], [0], [1], [0, 0, 1, 1], [], []>} : vector<1x32xbf16>, vector<32x128xbf16>, vector<1x128xf32> -> vector<1x128xf32>
      %c0_21 = arith.constant 0 : index
      %c0_22 = arith.constant 0 : index
      %c0_23 = arith.constant 0 : index
      %56 = vector.load %arg6[%c0_21, %c0_22, %c0_23] : memref<1x1x128xf32, #tpu.memory_space<vmem>>, vector<1x1x128xf32>
      %57 = vector.shape_cast %56 : vector<1x1x128xf32> to vector<1x128xf32>
      %58 = vector.shape_cast %55 : vector<1x128xf32> to vector<1x1x128xf32>
      tpu.vector_store %arg6[%c0_21, %c0_22, %c0_23], %58 {strides = array<i32>} : memref<1x1x128xf32, #tpu.memory_space<vmem>>, vector<1x1x128xf32>,
    } else {
    }
    return
  }
  func.func @transform_0(%arg0: i32, %arg1: i32) -> (i32, i32, i32, i32) {
    %c0_i32 = arith.constant 0 : i32
    %c0_i32_0 = arith.constant 0 : i32
    %c0_i32_1 = arith.constant 0 : i32
    %c0_i32_2 = arith.constant 0 : i32
    return %arg0, %c0_i32, %c0_i32_0, %c0_i32_1 : i32, i32, i32, i32
  }
  func.func @transform_1(%arg0: i32, %arg1: i32) -> (i32, i32) {
    %c0_i32 = arith.constant 0 : i32
    %c0_i32_0 = arith.constant 0 : i32
    %c0_i32_1 = arith.constant 0 : i32
    return %c0_i32, %c0_i32_0 : i32, i32
  }
  func.func @transform_2(%arg0: i32, %arg1: i32) -> (i32, i32) {
    %c0_i32 = arith.constant 0 : i32
    %c0_i32_0 = arith.constant 0 : i32
    %c0_i32_1 = arith.constant 0 : i32
    return %c0_i32, %c0_i32_0 : i32, i32
  }
  func.func @transform_3(%arg0: i32, %arg1: i32) -> (i32, i32) {
    %c0_i32 = arith.constant 0 : i32
    %c0_i32_0 = arith.constant 0 : i32
    %c0_i32_1 = arith.constant 0 : i32
    return %c0_i32, %c0_i32_0 : i32, i32
  }
  func.func @transform_4(%arg0: i32, %arg1: i32) -> (i32, i32, i32) {
    %c0_i32 = arith.constant 0 : i32
    %c0_i32_0 = arith.constant 0 : i32
    %c0_i32_1 = arith.constant 0 : i32
    return %arg0, %c0_i32, %c0_i32_0 : i32, i32, i32
  }
}

</mosaic_0001>

<bundles_post_ra>
// kernel: tpu_custom_call.1
= control target key start
LH: loop header
LB: loop body
LE: loop exit
PB: predicated region body
PF: predicated region fallthrough
CT: control target
= control target key end

     0   :  { %9 = vsyncpa [#allocation5], 0  ;;  %s3050_s0 = inlined_call_operand.vmem [shape: bf16[2,16,16,4], index: 0, kind: input, shape index: {}]   ;;  %s3051_s1 = inlined_call_operand.vmem [shape: bf16[36,32], index: 1, kind: input, shape index: {}]   ;;  %s3052_s2 = inlined_call_operand.vmem [shape: f32[1,32], index: 2, kind: input, shape index: {}]   ;;  %s3053_s3 = inlined_call_operand.vmem [shape: bf16[32,128], index: 3, kind: input, shape index: {}]   ;;  %s3054_s4 = inlined_call_operand.hbm [shape: f32[2,1,128], index: 4, kind: output, shape index: {}]  }
   0x1   :  { %11 = vsyncpa [#allocation5 + $0x1], 0  ;;  %s2256_s15 = smov 0   ;;  %s2258_s16 = smov 0  }
   0x2   :  { %s2260_s17 = smov 0   ;;  %s2262_s18 = smov 0  }
   0x3   :  { %s2264_s19 = smov 0   ;;  %s2266_s20 = smov 0  }
   0x4   :  { %s2268_s21 = smov 0   ;;  %s2270_s22 = smov 0  }
   0x5 LB: > { %s1553_s23 = sadd.s32 4294967295, %s2217_s22   ;;  %s1554_s24 = sadd.s32 4294967294, %s2217_s22   ;;  %s2217_s22 = sphi %s2270_s22, %s17_s22   ;;  %s2213_s21 = sphi %s2268_s21, %s3063_s21   ;;  %s2209_s20 = sphi %s2266_s20, %s3062_s20   ;;  %s2205_s19 = sphi %s2264_s19, %s3061_s19   ;;  %s2201_s18 = sphi %s2262_s18, %s3060_s18   ;;  %s2197_s17 = sphi %s2260_s17, %s3059_s17   ;;  %s2193_s16 = sphi %s2258_s16, %s3058_s16   ;;  %s2189_s15 = sphi %s2256_s15, %s3057_s15  }
   0x6   : > { %s26_s25 = sadd.s32 1, %s2209_s20  ;;  %s29_s26 = sadd.s32 1, %s2213_s21 }
   0x7   : > { %p27_p0 = scmp.ge.s32.totalorder %s26_s25, 2  ;;  %p135_p1 = scmp.ne.s32.totalorder %s2197_s17, %s2193_s16 }
   0x8   : > { %p136_p2 = scmp.eq.s32.totalorder %s1553_s23, 3  ;;  %p141_p4 = scmp.ne.s32.totalorder %s2193_s16, %s2189_s15 }
   0x9   : > { %s3065_s25 = smov (%p27_p0, %s26_s25), 0  ;;  %s3067_s26 = smov (!%p27_p0, %s29_s26), %s2213_s21 }
   0xa   : > { %p2305_p3 = por %p136_p2, %p135_p1  ;;  %p31_p5 = scmp.ge.s32.totalorder %s3067_s26, 2 }
   0xb   : > { %p142_p6 = scmp.eq.s32.totalorder %s1554_s24, 3  ;;  %p1557_p7 = scmp.ge.s32.totalorder %s2217_s22, 1 }
   0xc   : > { %p177_p8 = scmp.lt.s32.totalorder %s2217_s22, 5  ;;  %s3069_s26 = smov (%p31_p5, %s3067_s26), 0 }
   0xd   : > { %p2315_p9 = por %p142_p6, %p141_p4  ;;  %s122_s29 = ssub.s32 %s2213_s21, %s3069_s26 }
   0xe   : > { %p178_p10 = pnand %p1557_p7, %p177_p8  ;;  %s125_s30 = sadd.s32 1, %s2197_s17 }
   0xf   : > { %p123_p11 = scmp.eq.s32.totalorder %s122_s29, 0  ;;  %s200_s6 = sand.u32 (!%p178_p10), 1, %s2193_s16  }
  0x10   : > { %181 = sbr.rel (%p178_p10) target bundleno = 969 (0x3c9), region = 36  ;;  %p202_p12 = scmp.lt.s32.totalorder (!%p178_p10), %s2205_s19, 1 }
  0x11   : > { %s2323_s5 = scalar_select %p123_p11, %s2197_s17, %s125_s30  }
  0x12   : > { %s2335_s12 = scalar_lea.vmem (!%p178_p10), [#allocation4], %s200_s6  ;;  %p1560_p13 = scmp.ne.s32.totalorder (!%p178_p10), %s2201_s18, 0 }
  0x17   : > { %s203_s7 = scalar_select %p202_p12, %s2205_s19, 1 }
  0x18   : > { %211 = sbr.rel (%p1560_p13) target bundleno = 60 (0x3c), region = 40  ;;  %vm212_vm0 = vcmask (!%p1560_p13), 253952   ;;  %vm439_vm1 = vcmask (!%p1560_p13), 31744   ;;  %vm442_vm2 = vcmask (!%p1560_p13), 25600   ;;  %v2219_v2 = vmov (!%p1560_p13), 0.0  }
  0x19   : > { %s1582_s8 = sshll.u32 %s203_s7, 7  ;;  %213 = vst.msk [vmem:[#allocation3] sm:$0x1] (!%p1560_p13), %vm212_vm0, %v2219_v2  ;;  %vm310_vm3 = vcmask (!%p1560_p13), 1040384  }
  0x1a   : > { %s2331_s11 = scalar_lea.vmem %s3050_s0, %s1582_s8  ;;  %440 = vst.msk [vmem:[#allocation2] sm:$0xff] (!%p1560_p13), %vm439_vm1, %v2219_v2  ;;  %441 = vst.msk [vmem:[#allocation2 + $0x8] sm:$0xff] (!%p1560_p13), %vm439_vm1, %v2219_v2 }
  0x1b   : > { %v1584_v0 = vld [vmem:[%s2331_s11] sm:$0xff] (!%p1560_p13)   ;;  %v1647_v1 = vld [vmem:[%s2331_s11 + $0x8] sm:$0xff] (!%p1560_p13)   ;;  %492 = vst.msk [vmem:[#allocation2 + $0x198] sm:$0xff] (!%p1560_p13), %vm439_vm1, %v2219_v2  ;;  %493 = vst.msk [vmem:[#allocation2 + $0x1a0] sm:$0xff] (!%p1560_p13), %vm439_vm1, %v2219_v2 }
  0x1c   : > { %443 = vst.msk [vmem:[#allocation2 + $0x10] sm:$0x3] (!%p1560_p13), %vm442_vm2, %v2219_v2  ;;  %494 = vst.msk [vmem:[#allocation2 + $0x1a8] sm:$0x3] (!%p1560_p13), %vm442_vm2, %v2219_v2  ;;  %v1585_v3 = vunpack.c.l.bf16 (!%p1560_p13), %v1584_v0  ;;  %v1586_v4 = vunpack.c.h.bf16 (!%p1560_p13), %v1584_v0  ;;  %v1589_v5 = vunpack.c.l.bf16 (!%p1560_p13), %v1647_v1  ;;  %v1648_v6 = vld [vmem:[%s2331_s11 + $0x10] sm:$0xff] (!%p1560_p13)   ;;  %v1649_v7 = vld [vmem:[%s2331_s11 + $0x18] sm:$0xff] (!%p1560_p13)   ;;  %v1590_v8 = vunpack.c.h.bf16 (!%p1560_p13), %v1647_v1 }
  0x1d   : > { %v1593_v9 = vunpack.c.l.bf16 (!%p1560_p13), %v1648_v6  ;;  %v1594_v10 = vunpack.c.h.bf16 (!%p1560_p13), %v1648_v6  ;;  %v1597_v11 = vunpack.c.l.bf16 (!%p1560_p13), %v1649_v7  ;;  %v1598_v15 = vunpack.c.h.bf16 (!%p1560_p13), %v1649_v7  ;;  %v1650_v20 = vld [vmem:[%s2331_s11 + $0x20] sm:$0xff] (!%p1560_p13)   ;;  %v1651_v25 = vld [vmem:[%s2331_s11 + $0x28] sm:$0xff] (!%p1560_p13)   ;;  %v1652_v26 = vld [vmem:[%s2331_s11 + $0x30] sm:$0xff] (!%p1560_p13)  }
  0x1e   : > { %v311_v12 = vrot.slane (!%p1560_p13), %v1585_v3, 7  ;;  %v312_v13 = vrot.slane (!%p1560_p13), %v1586_v4, 7  ;;  %v314_v14 = vrot.slane (!%p1560_p13), %v1589_v5, 7  ;;  %v315_v16 = vrot.slane (!%p1560_p13), %v1590_v8, 7  ;;  %v1653_v39 = vld [vmem:[%s2331_s11 + $0x38] sm:$0xff] (!%p1560_p13)   ;;  %v1654_v52 = vld [vmem:[%s2331_s11 + $0x40] sm:$0xff] (!%p1560_p13)  }
  0x1f   : > { %v317_v17 = vrot.slane %v1593_v9, 7  ;;  %v318_v18 = vrot.slane %v1594_v10, 7  ;;  %v320_v19 = vrot.slane %v1597_v11, 7  ;;  %v321_v33 = vrot.slane %v1598_v15, 7  ;;  %v1655_v57 = vld [vmem:[%s2331_s11 + $0x48] sm:$0xff]   ;;  %v1656_v58 = vld [vmem:[%s2331_s11 + $0x50] sm:$0xff]  }
  0x20   : > { %v407_v21 = vsel %vm310_vm3, 0.0, %v311_v12  ;;  %v313_v22 = vsel %vm310_vm3, %v311_v12, %v312_v13  ;;  %v423_v23 = vsel %vm310_vm3, %v312_v13, 0.0  ;;  %v408_v24 = vsel %vm310_vm3, 0.0, %v314_v14  ;;  %v1657_v7 = vld [vmem:[%s2331_s11 + $0x58] sm:$0xff]  }
  0x21   : > { %444 = vst.msk [vmem:[#allocation2 + $0x18] sm:$0xff] %vm439_vm1, %v407_v21  ;;  %445 = vst.msk [vmem:[#allocation2 + $0x20] sm:$0xff] %vm439_vm1, %v313_v22  ;;  %v316_v27 = vsel %vm310_vm3, %v314_v14, %v315_v16  ;;  %v424_v28 = vsel %vm310_vm3, %v315_v16, 0.0  ;;  %v409_v29 = vsel %vm310_vm3, 0.0, %v317_v17  ;;  %v319_v30 = vsel %vm310_vm3, %v317_v17, %v318_v18 }
  0x22   : > { %446 = vst.msk [vmem:[#allocation2 + $0x28] sm:$0x3] %vm442_vm2, %v423_v23  ;;  %449 = vst.msk [vmem:[#allocation2 + $0x40] sm:$0x3] %vm442_vm2, %v424_v28  ;;  %v425_v31 = vsel %vm310_vm3, %v318_v18, 0.0  ;;  %v410_v32 = vsel %vm310_vm3, 0.0, %v320_v19  ;;  %v1601_v34 = vunpack.c.l.bf16 %v1650_v20  ;;  %v1602_v35 = vunpack.c.h.bf16 %v1650_v20 }
  0x23   : > { %447 = vst.msk [vmem:[#allocation2 + $0x30] sm:$0xff] %vm439_vm1, %v408_v24  ;;  %448 = vst.msk [vmem:[#allocation2 + $0x38] sm:$0xff] %vm439_vm1, %v316_v27  ;;  %v1605_v36 = vunpack.c.l.bf16 %v1651_v25  ;;  %v1606_v37 = vunpack.c.h.bf16 %v1651_v25  ;;  %v1609_v38 = vunpack.c.l.bf16 %v1652_v26  ;;  %v322_v40 = vsel %vm310_vm3, %v320_v19, %v321_v33  ;;  %v1658_v20 = vld [vmem:[%s2331_s11 + $0x60] sm:$0xff]   ;;  %v1659_v25 = vld [vmem:[%s2331_s11 + $0x68] sm:$0xff]  }
  0x24   : > { %450 = vst.msk [vmem:[#allocation2 + $0x48] sm:$0xff] %vm439_vm1, %v409_v29  ;;  %451 = vst.msk [vmem:[#allocation2 + $0x50] sm:$0xff] %vm439_vm1, %v319_v30  ;;  %v426_v41 = vsel %vm310_vm3, %v321_v33, 0.0  ;;  %v323_v42 = vrot.slane %v1601_v34, 7  ;;  %v1610_v43 = vunpack.c.h.bf16 %v1652_v26  ;;  %v324_v44 = vrot.slane %v1602_v35, 7  ;;  %v1660_v26 = vld [vmem:[%s2331_s11 + $0x70] sm:$0xff]  }
  0x25   : > { %452 = vst.msk [vmem:[#allocation2 + $0x58] sm:$0x3] %vm442_vm2, %v425_v31  ;;  %455 = vst.msk [vmem:[#allocation2 + $0x70] sm:$0x3] %vm442_vm2, %v426_v41  ;;  %v326_v45 = vrot.slane %v1605_v36, 7  ;;  %v327_v46 = vrot.slane %v1606_v37, 7  ;;  %v1613_v50 = vunpack.c.l.bf16 %v1653_v39  ;;  %v1614_v51 = vunpack.c.h.bf16 %v1653_v39 }
  0x26   : > { %453 = vst.msk [vmem:[#allocation2 + $0x60] sm:$0xff] %vm439_vm1, %v410_v32  ;;  %454 = vst.msk [vmem:[#allocation2 + $0x68] sm:$0xff] %vm439_vm1, %v322_v40  ;;  %v329_v47 = vrot.slane %v1609_v38, 7  ;;  %v411_v48 = vsel %vm310_vm3, 0.0, %v323_v42  ;;  %v330_v49 = vrot.slane %v1610_v43, 7  ;;  %v325_v53 = vsel %vm310_vm3, %v323_v42, %v324_v44  ;;  %v1661_v39 = vld [vmem:[%s2331_s11 + $0x78] sm:$0xff]  }
  0x27   : > { %456 = vst.msk [vmem:[#allocation2 + $0x78] sm:$0xff] %vm439_vm1, %v411_v48  ;;  %v427_v54 = vsel %vm310_vm3, %v324_v44, 0.0  ;;  %v412_v55 = vsel %vm310_vm3, 0.0, %v326_v45  ;;  %v328_v56 = vsel %vm310_vm3, %v326_v45, %v327_v46  ;;  %457 = vst.msk [vmem:[#allocation2 + $0x80] sm:$0xff] %vm439_vm1, %v325_v53  ;;  %v428_v59 = vsel %vm310_vm3, %v327_v46, 0.0 }
  0x28   : > { %458 = vst.msk [vmem:[#allocation2 + $0x88] sm:$0x3] %vm442_vm2, %v427_v54  ;;  %v413_v60 = vsel %vm310_vm3, 0.0, %v329_v47  ;;  %v331_v61 = vsel %vm310_vm3, %v329_v47, %v330_v49  ;;  %v429_v62 = vsel %vm310_vm3, %v330_v49, 0.0  ;;  %461 = vst.msk [vmem:[#allocation2 + $0xa0] sm:$0x3] %vm442_vm2, %v428_v59  ;;  %v1617_v1 = vunpack.c.l.bf16 %v1654_v52 }
  0x29   : > { %459 = vst.msk [vmem:[#allocation2 + $0x90] sm:$0xff] %vm439_vm1, %v412_v55  ;;  %460 = vst.msk [vmem:[#allocation2 + $0x98] sm:$0xff] %vm439_vm1, %v328_v56  ;;  %v332_v63 = vrot.slane %v1613_v50, 7  ;;  %v333_v0 = vrot.slane %v1614_v51, 7  ;;  %v1618_v2 = vunpack.c.h.bf16 %v1654_v52  ;;  %v1621_v3 = vunpack.c.l.bf16 %v1655_v57 }
  0x2a   : > { %462 = vst.msk [vmem:[#allocation2 + $0xa8] sm:$0xff] %vm439_vm1, %v413_v60  ;;  %463 = vst.msk [vmem:[#allocation2 + $0xb0] sm:$0xff] %vm439_vm1, %v331_v61  ;;  %v1622_v4 = vunpack.c.h.bf16 %v1655_v57  ;;  %v1625_v5 = vunpack.c.l.bf16 %v1656_v58  ;;  %v1626_v6 = vunpack.c.h.bf16 %v1656_v58  ;;  %v335_v11 = vrot.slane %v1617_v1, 7 }
  0x2b   : > { %464 = vst.msk [vmem:[#allocation2 + $0xb8] sm:$0x3] %vm442_vm2, %v429_v62  ;;  %v414_v8 = vsel %vm310_vm3, 0.0, %v332_v63  ;;  %v334_v9 = vsel %vm310_vm3, %v332_v63, %v333_v0  ;;  %v430_v10 = vsel %vm310_vm3, %v333_v0, 0.0  ;;  %v336_v12 = vrot.slane %v1618_v2, 7 }
  0x2c   : > { %465 = vst.msk [vmem:[#allocation2 + $0xc0] sm:$0xff] %vm439_vm1, %v414_v8  ;;  %466 = vst.msk [vmem:[#allocation2 + $0xc8] sm:$0xff] %vm439_vm1, %v334_v9  ;;  %v338_v13 = vrot.slane %v1621_v3, 7  ;;  %v339_v14 = vrot.slane %v1622_v4, 7  ;;  %v341_v15 = vrot.slane %v1625_v5, 7  ;;  %v415_v16 = vsel %vm310_vm3, 0.0, %v335_v11 }
  0x2d   : > { %467 = vst.msk [vmem:[#allocation2 + $0xd0] sm:$0x3] %vm442_vm2, %v430_v10  ;;  %v342_v17 = vrot.slane %v1626_v6, 7  ;;  %v1629_v18 = vunpack.c.l.bf16 %v1657_v7  ;;  %v1630_v19 = vunpack.c.h.bf16 %v1657_v7  ;;  %v337_v21 = vsel %vm310_vm3, %v335_v11, %v336_v12 }
  0x2e   : > { %468 = vst.msk [vmem:[#allocation2 + $0xd8] sm:$0xff] %vm439_vm1, %v415_v16  ;;  %v431_v22 = vsel %vm310_vm3, %v336_v12, 0.0  ;;  %v416_v23 = vsel %vm310_vm3, 0.0, %v338_v13  ;;  %v340_v24 = vsel %vm310_vm3, %v338_v13, %v339_v14  ;;  %469 = vst.msk [vmem:[#allocation2 + $0xe0] sm:$0xff] %vm439_vm1, %v337_v21  ;;  %v432_v27 = vsel %vm310_vm3, %v339_v14, 0.0 }
  0x2f   : > { %470 = vst.msk [vmem:[#allocation2 + $0xe8] sm:$0x3] %vm442_vm2, %v431_v22  ;;  %v417_v28 = vsel %vm310_vm3, 0.0, %v341_v15  ;;  %v343_v29 = vsel %vm310_vm3, %v341_v15, %v342_v17  ;;  %v433_v30 = vsel %vm310_vm3, %v342_v17, 0.0  ;;  %473 = vst.msk [vmem:[#allocation2 + $0x100] sm:$0x3] %vm442_vm2, %v432_v27  ;;  %v1633_v33 = vunpack.c.l.bf16 %v1658_v20 }
  0x30   : > { %471 = vst.msk [vmem:[#allocation2 + $0xf0] sm:$0xff] %vm439_vm1, %v416_v23  ;;  %472 = vst.msk [vmem:[#allocation2 + $0xf8] sm:$0xff] %vm439_vm1, %v340_v24  ;;  %v344_v31 = vrot.slane %v1629_v18, 7  ;;  %v345_v32 = vrot.slane %v1630_v19, 7  ;;  %v1634_v34 = vunpack.c.h.bf16 %v1658_v20  ;;  %v1637_v35 = vunpack.c.l.bf16 %v1659_v25 }
  0x31   : > { %474 = vst.msk [vmem:[#allocation2 + $0x108] sm:$0xff] %vm439_vm1, %v417_v28  ;;  %475 = vst.msk [vmem:[#allocation2 + $0x110] sm:$0xff] %vm439_vm1, %v343_v29  ;;  %v1638_v36 = vunpack.c.h.bf16 %v1659_v25  ;;  %v1641_v37 = vunpack.c.l.bf16 %v1660_v26  ;;  %v1642_v38 = vunpack.c.h.bf16 %v1660_v26  ;;  %v347_v43 = vrot.slane %v1633_v33, 7 }
  0x32   : > { %476 = vst.msk [vmem:[#allocation2 + $0x118] sm:$0x3] %vm442_vm2, %v433_v30  ;;  %v418_v40 = vsel %vm310_vm3, 0.0, %v344_v31  ;;  %v346_v41 = vsel %vm310_vm3, %v344_v31, %v345_v32  ;;  %v434_v42 = vsel %vm310_vm3, %v345_v32, 0.0  ;;  %v348_v44 = vrot.slane %v1634_v34, 7 }
  0x33   : > { %477 = vst.msk [vmem:[#allocation2 + $0x120] sm:$0xff] %vm439_vm1, %v418_v40  ;;  %478 = vst.msk [vmem:[#allocation2 + $0x128] sm:$0xff] %vm439_vm1, %v346_v41  ;;  %v350_v45 = vrot.slane %v1637_v35, 7  ;;  %v351_v46 = vrot.slane %v1638_v36, 7  ;;  %v353_v47 = vrot.slane %v1641_v37, 7  ;;  %v419_v48 = vsel %vm310_vm3, 0.0, %v347_v43 }
  0x34   : > { %479 = vst.msk [vmem:[#allocation2 + $0x130] sm:$0x3] %vm442_vm2, %v434_v42  ;;  %v354_v49 = vrot.slane %v1642_v38, 7  ;;  %v1645_v50 = vunpack.c.l.bf16 %v1661_v39  ;;  %v1646_v51 = vunpack.c.h.bf16 %v1661_v39  ;;  %v349_v52 = vsel %vm310_vm3, %v347_v43, %v348_v44 }
  0x35   : > { %480 = vst.msk [vmem:[#allocation2 + $0x138] sm:$0xff] %vm439_vm1, %v419_v48  ;;  %v435_v53 = vsel %vm310_vm3, %v348_v44, 0.0  ;;  %v420_v54 = vsel %vm310_vm3, 0.0, %v350_v45  ;;  %v352_v55 = vsel %vm310_vm3, %v350_v45, %v351_v46  ;;  %481 = vst.msk [vmem:[#allocation2 + $0x140] sm:$0xff] %vm439_vm1, %v349_v52  ;;  %v436_v56 = vsel %vm310_vm3, %v351_v46, 0.0 }
  0x36   : > { %482 = vst.msk [vmem:[#allocation2 + $0x148] sm:$0x3] %vm442_vm2, %v435_v53  ;;  %v421_v57 = vsel %vm310_vm3, 0.0, %v353_v47  ;;  %v355_v58 = vsel %vm310_vm3, %v353_v47, %v354_v49  ;;  %v437_v59 = vsel %vm310_vm3, %v354_v49, 0.0  ;;  %485 = vst.msk [vmem:[#allocation2 + $0x160] sm:$0x3] %vm442_vm2, %v436_v56 }
  0x37   : > { %483 = vst.msk [vmem:[#allocation2 + $0x150] sm:$0xff] %vm439_vm1, %v420_v54  ;;  %484 = vst.msk [vmem:[#allocation2 + $0x158] sm:$0xff] %vm439_vm1, %v352_v55  ;;  %v356_v60 = vrot.slane %v1645_v50, 7  ;;  %v357_v61 = vrot.slane %v1646_v51, 7 }
  0x38   : > { %486 = vst.msk [vmem:[#allocation2 + $0x168] sm:$0xff] %vm439_vm1, %v421_v57  ;;  %487 = vst.msk [vmem:[#allocation2 + $0x170] sm:$0xff] %vm439_vm1, %v355_v58 }
  0x39   : > { %488 = vst.msk [vmem:[#allocation2 + $0x178] sm:$0x3] %vm442_vm2, %v437_v59  ;;  %v422_v62 = vsel %vm310_vm3, 0.0, %v356_v60  ;;  %v358_v63 = vsel %vm310_vm3, %v356_v60, %v357_v61  ;;  %v438_v0 = vsel %vm310_vm3, %v357_v61, 0.0 }
  0x3a   : > { %489 = vst.msk [vmem:[#allocation2 + $0x180] sm:$0xff] %vm439_vm1, %v422_v62  ;;  %490 = vst.msk [vmem:[#allocation2 + $0x188] sm:$0xff] %vm439_vm1, %v358_v63 }
  0x3b   : > { %491 = vst.msk [vmem:[#allocation2 + $0x190] sm:$0x3] %vm442_vm2, %v438_v0 }
  0x3c PF: > { %s1562_s13 = smul.u32 192, %s2201_s18  ;;  %vm593_vm4 = vcmask 1045504   ;;  %vm552_vm5 = vcmask 1046528   ;;  %s2220_s23 = smov 8   ;;  %v2116_v50 = vld [vmem:[%s3051_s1] sm:$0xff]   ;;  %v2117_v56 = vld [vmem:[%s3051_s1 + $0x8] sm:$0xff]  }
  0x3d   : > { %s2221_s24 = smov 4   ;;  %s2222_s29 = smov 12   ;;  %1676 = vmatprep.subr.bf16.mxu0 %v2116_v50  ;;  %1706 = vmatprep.subr.bf16.mxu1 %v2116_v50  ;;  %vm1240_vm6 = vcmask 1041408   ;;  %vm1044_vm7 = vcmask 31744   ;;  %vm1061_vm8 = vcmask 64512   ;;  %vm1078_vm9 = vcmask 97280  }
  0x3e   : > { %s2457_s14 = scalar_lea.vmem [#allocation2], %s1562_s13  ;;  %s2223_s8 = smov 16   ;;  %1677 = vmatpush3.bf16.msra.mxu0 %v2116_v50  ;;  %1709 = vmatpush3.bf16.msra.mxu1 %v2116_v50  ;;  %vm1095_vm10 = vcmask 130048   ;;  %vm1112_vm11 = vcmask 162816   ;;  %vm1129_vm12 = vcmask 195584   ;;  %vm1146_vm13 = vcmask 228352  }
  0x3f   : > { %s2224_s11 = smov 20   ;;  %1678 = vmatprep.subr.bf16.mxu0 %v2117_v56  ;;  %1707 = vmatprep.subr.bf16.mxu1 %v2117_v56  ;;  %s2225_s13 = smov 24   ;;  %vm1163_vm14 = vcmask 261120   ;;  %vm1215_vm15 = vcmask 293888   ;;  %vm1396_vm0 = vcmask 253952  }
  0x40   : > { %s2226_s30 = smov 28   ;;  %s2227_s7 = smov 32  }
  0x41   : > { %p1575_p0 = scmp.ne.s32.totalorder %s2201_s18, 1 }
  0x42   : > { %v2460_v1 = vld [vmem:[%s2457_s14] sm:$0xff]  ;;  %v2463_v2 = vld [vmem:[%s2457_s14 + $0x8] sm:$0xff]  ;;  %v500_v3 = vld [vmem:[%s2457_s14 + $0x10] sm:$0x3]  ;;  %1679 = vmatpush3.bf16.msra.mxu0 %v2117_v56  ;;  %1710 = vmatpush3.bf16.msra.mxu1 %v2117_v56  ;;  %vm2229_vm1 = vmmov (!%p1575_p0), 0  }
  0x43   : > { %v594_v4 = vrot.slane %v2460_v1, 2  ;;  %v595_v5 = vrot.slane %v2463_v2, 2  ;;  %v597_v6 = vrot.slane %v500_v3, 2  ;;  %v553_v7 = vrot.slane %v2460_v1, 1  ;;  %v2470_v8 = vld [vmem:[%s2457_s14 + $0x18] sm:$0xff]  ;;  %v2473_v9 = vld [vmem:[%s2457_s14 + $0x20] sm:$0xff] }
  0x44   : > { %v554_v10 = vrot.slane %v2463_v2, 1  ;;  %v556_v11 = vrot.slane %v500_v3, 1  ;;  %v503_v12 = vld [vmem:[%s2457_s14 + $0x28] sm:$0x3]  ;;  %v599_v13 = vrot.slane %v2470_v8, 2  ;;  %v600_v14 = vrot.slane %v2473_v9, 2 }
  0x45   : > { %v596_v15 = vsel %vm593_vm4, %v594_v4, %v595_v5  ;;  %v598_v16 = vsel %vm593_vm4, %v595_v5, %v597_v6  ;;  %v602_v17 = vrot.slane %v503_v12, 2  ;;  %v558_v18 = vrot.slane %v2470_v8, 1  ;;  %v2483_v19 = vld [vmem:[%s2457_s14 + $0x30] sm:$0xff]  ;;  %v2489_v24 = vld [vmem:[%s2457_s14 + $0x38] sm:$0xff]  ;;  %v506_v25 = vld [vmem:[%s2457_s14 + $0x40] sm:$0x3] }
  0x46   : > { %v1811_v20 = vpack.i.bf16 %v598_v16, %v596_v15  ;;  %v555_v21 = vsel %vm552_vm5, %v553_v7, %v554_v10  ;;  %v557_v22 = vsel %vm552_vm5, %v554_v10, %v556_v11  ;;  %v601_v23 = vsel %vm593_vm4, %v599_v13, %v600_v14  ;;  %v2517_v47 = vld [vmem:[%s2457_s14 + $0x48] sm:$0xff]  ;;  %v2520_v48 = vld [vmem:[%s2457_s14 + $0x50] sm:$0xff]  ;;  %v509_v49 = vld [vmem:[%s2457_s14 + $0x58] sm:$0x3] }
  0x47   : > { %v1796_v26 = vpack.i.bf16 %v557_v22, %v555_v21  ;;  %v603_v27 = vsel %vm593_vm4, %v600_v14, %v602_v17  ;;  %v559_v28 = vrot.slane %v2473_v9, 1  ;;  %v561_v29 = vrot.slane %v503_v12, 1  ;;  %v2534_v55 = vld [vmem:[%s2457_s14 + $0x90] sm:$0xff]  ;;  %v2548_v60 = vld [vmem:[%s2457_s14 + $0x98] sm:$0xff]  ;;  %v518_v61 = vld [vmem:[%s2457_s14 + $0xa0] sm:$0x3] }
  0x48   : > { %1812 = vrot.lane.b32.xlu1 %v1811_v20, %s2220_s23  ;;  %v1816_v30 = vpack.i.bf16 %v603_v27, %v601_v23  ;;  %v563_v31 = vrot.slane %v2483_v19, 1  ;;  %v564_v34 = vrot.slane %v2489_v24, 1  ;;  %v566_v35 = vrot.slane %v506_v25, 1  ;;  %v2558_v5 = vld [vmem:[%s2457_s14 + $0x60] sm:$0xff]  ;;  %v2566_v12 = vld [vmem:[%s2457_s14 + $0xa8] sm:$0xff]  ;;  %v2569_v13 = vld [vmem:[%s2457_s14 + $0xb0] sm:$0xff] }
  0x49   : > { %1797 = vrot.lane.b32.xlu0 %v1796_v26, %s2221_s24  ;;  %v560_v32 = vsel %vm552_vm5, %v558_v18, %v559_v28  ;;  %v562_v33 = vsel %vm552_vm5, %v559_v28, %v561_v29  ;;  %v1821_v37 = vpack.i.bf16 %v2489_v24, %v2483_v19  ;;  %v1806_v38 = vpack.i.bf16 %v2473_v9, %v2470_v8  ;;  %v521_v14 = vld [vmem:[%s2457_s14 + $0xb8] sm:$0x3]  ;;  %v2587_v29 = vld [vmem:[%s2457_s14 + $0x68] sm:$0xff]  ;;  %v2616_v50 = vld [vmem:[%s2457_s14 + $0xe0] sm:$0xff] }
  0x4a   : > { %v1801_v36 = vpack.i.bf16 %v562_v33, %v560_v32  ;;  %v604_v39 = vrot.slane %v2483_v19, 2  ;;  %v565_v40 = vsel %vm552_vm5, %v563_v31, %v564_v34  ;;  %v567_v41 = vsel %vm552_vm5, %v564_v34, %v566_v35  ;;  %v2592_v31 = vld [vmem:[%s2457_s14 + $0xc0] sm:$0xff]  ;;  %v2625_v56 = vld [vmem:[%s2457_s14 + $0xd8] sm:$0xff] }
  0x4b   : > { %v605_v42 = vrot.slane %v2489_v24, 2  ;;  %v607_v43 = vrot.slane %v506_v25, 2  ;;  %v2511_v44 = vpack.i.bf16 %v567_v41, %v565_v40  ;;  %v568_v52 = vrot.slane %v2517_v47, 1 }
  0x4c   : > { %1817 = vrot.lane.b32.xlu1 %v1816_v30, %s2220_s23  ;;  %v569_v53 = vrot.slane %v2520_v48, 1  ;;  %v571_v54 = vrot.slane %v509_v49, 1  ;;  %v2543_v57 = vpack.i.bf16 %v2520_v48, %v2517_v47  ;;  %v609_v62 = vrot.slane %v2517_v47, 2 }
  0x4d   : > { %1802 = vrot.lane.b32.xlu0 %v1801_v36, %s2221_s24  ;;  %v606_v45 = vsel %vm593_vm4, %v604_v39, %v605_v42  ;;  %v608_v46 = vsel %vm593_vm4, %v605_v42, %v607_v43  ;;  %v610_v63 = vrot.slane %v2520_v48, 2  ;;  %v612_v0 = vrot.slane %v509_v49, 2 }
  0x4e   : > { %v2528_v51 = vpack.i.bf16 %v608_v46, %v606_v45  ;;  %v570_v58 = vsel %vm552_vm5, %v568_v52, %v569_v53  ;;  %v572_v59 = vsel %vm552_vm5, %v569_v53, %v571_v54  ;;  %v583_v3 = vrot.slane %v2534_v55, 1 }
  0x4f   : > { %v2555_v4 = vpack.i.bf16 %v572_v59, %v570_v58  ;;  %v584_v6 = vrot.slane %v2548_v60, 1  ;;  %v586_v7 = vrot.slane %v518_v61, 1  ;;  %v624_v10 = vrot.slane %v2534_v55, 2 }
  0x50   : > { %1822 = vrot.lane.b32.xlu1 %v1821_v37, %s2222_s29  ;;  %v625_v11 = vrot.slane %v2548_v60, 2  ;;  %v611_v15 = vsel %vm593_vm4, %v609_v62, %v610_v63  ;;  %v627_v18 = vrot.slane %v518_v61, 2  ;;  %v613_v20 = vsel %vm593_vm4, %v610_v63, %v612_v0  ;;  %v527_v62 = vld [vmem:[%s2457_s14 + $0xe8] sm:$0x3] }
  0x51   : > { %1807 = vrot.lane.b32.xlu0 %v1806_v38, %s2222_s29  ;;  %v585_v16 = vsel %vm552_vm5, %v583_v3, %v584_v6  ;;  %v587_v17 = vsel %vm552_vm5, %v584_v6, %v586_v7  ;;  %v573_v21 = vrot.slane %v2558_v5, 1  ;;  %v588_v26 = vrot.slane %v2566_v12, 1 }
  0x52   : > { %v2578_v22 = vpack.i.bf16 %v587_v17, %v585_v16  ;;  %v626_v23 = vsel %vm593_vm4, %v624_v10, %v625_v11  ;;  %v628_v25 = vsel %vm593_vm4, %v625_v11, %v627_v18  ;;  %v589_v27 = vrot.slane %v2569_v13, 1 }
  0x53   : > { %v591_v28 = vrot.slane %v521_v14, 1  ;;  %v629_v34 = vrot.slane %v2566_v12, 2  ;;  %v630_v35 = vrot.slane %v2569_v13, 2  ;;  %v632_v39 = vrot.slane %v521_v14, 2 }
  0x54   : > { %1832 = vrot.lane.b32.xlu1 %v2511_v44, %s2223_s8  ;;  %v590_v32 = vsel %vm552_vm5, %v588_v26, %v589_v27  ;;  %v2606_v40 = vpack.i.bf16 %v613_v20, %v611_v15  ;;  %v574_v41 = vrot.slane %v2587_v29, 1  ;;  %v637_v43 = vrot.slane %v2592_v31, 1 }
  0x55   : > { %1827 = vrot.lane.b32.xlu0 %v1801_v36, %s2223_s8  ;;  %v592_v33 = vsel %vm552_vm5, %v589_v27, %v591_v28  ;;  %v2601_v36 = vld [vmem:[%s2457_s14 + $0xc8] sm:$0xff]  ;;  %v631_v42 = vsel %vm593_vm4, %v629_v34, %v630_v35  ;;  %v633_v45 = vsel %vm593_vm4, %v630_v35, %v632_v39  ;;  %v642_v53 = vrot.slane %v2592_v31, 2 }
  0x56   : > { %v2604_v38 = vpack.i.bf16 %v592_v33, %v590_v32  ;;  %v638_v46 = vrot.slane %v2601_v36, 1  ;;  %v2620_v52 = vpack.i.bf16 %v633_v45, %v631_v42  ;;  %v643_v54 = vrot.slane %v2601_v36, 2  ;;  %v2683_v45 = vld [vmem:[%s2457_s14 + $0x80] sm:$0xff] }
  0x57   : > { %v651_v3 = vrot.slane %v2616_v50, 1  ;;  %v656_v6 = vrot.slane %v2616_v50, 2  ;;  %v650_v10 = vrot.slane %v2625_v56, 1  ;;  %v655_v11 = vrot.slane %v2625_v56, 2 }
  0x58   : > { %1842 = vrot.lane.b32.xlu1 %v2528_v51, %s2224_s11  ;;  %v639_v58 = vsel %vm552_vm5, %v637_v43, %v638_v46  ;;  %v644_v0 = vsel %vm593_vm4, %v642_v53, %v643_v54  ;;  %v653_v16 = vrot.slane %v527_v62, 1  ;;  %v1901_v17 = vpack.i.bf16 %v2587_v29, %v2558_v5  ;;  %v2680_v43 = vld [vmem:[%s2457_s14 + $0x78] sm:$0xff] }
  0x59   : > { %1837 = vrot.lane.b32.xlu0 %v1816_v30, %s2224_s11  ;;  %v2589_v30 = vpack.i.bf16 %v628_v25, %v626_v23  ;;  %v2648_v18 = vsel %vm552_vm5, %v650_v10, %v651_v3  ;;  %v2651_v20 = vsel %vm593_vm4, %v655_v11, %v656_v6  ;;  %v658_v23 = vrot.slane %v527_v62, 2  ;;  %v2118_v25 = vld [vmem:[%s3051_s1 + $0x10] ss:$0 sps:$4 sm:$0x33]  }
  0x5a   : > { %v614_v26 = vrot.slane %v2558_v5, 2  ;;  %v2658_v27 = vsel %vm552_vm5, %v651_v3, %v653_v16  ;;  %v575_v28 = vsel %vm552_vm5, %v573_v21, %v574_v41  ;;  %v615_v32 = vrot.slane %v2587_v29, 2  ;;  %1712 = vmatprep.subr.msk.bf16.mxu0 %vm1240_vm6, %v2118_v25  ;;  %1713 = vmatprep.subr.msk.bf16.mxu1 %vm1240_vm6, %v2118_v25 }
  0x5b   : > { %v2101_v33 = vpack.i.bf16 %v2658_v27, %v2648_v18  ;;  %v2667_v34 = vsel %vm593_vm4, %v656_v6, %v658_v23  ;;  %v1242_v39 = vsel %vm1240_vm6, %v2118_v25, 0  ;;  %v578_v53 = vrot.slane %v2680_v43, 1 }
  0x5c   : > { %1852 = vrot.lane.b32.xlu1 %v2543_v57, %s2225_s13  ;;  %v2111_v21 = vpack.i.bf16 %v2667_v34, %v2651_v20  ;;  %1681 = vmatpush3.bf16.msra.mxu0 %v1242_v39  ;;  %v620_v62 = vrot.slane %v2683_v45, 2  ;;  %v2011_v10 = vpack.i.bf16 %v2569_v13, %v2566_v12  ;;  %v2061_v11 = vpack.i.bf16 %v2601_v36, %v2592_v31 }
  0x5d   : > { %1847 = vrot.lane.b32.xlu0 %v1821_v37, %s2225_s13  ;;  %v524_v37 = vld [vmem:[%s2457_s14 + $0xd0] sm:$0x3]  ;;  %1711 = vmatpush3.bf16.msra.mxu1 %v1242_v39 }
  0x5e   : > { %v640_v49 = vrot.slane %v524_v37, 1  ;;  %v645_v61 = vrot.slane %v524_v37, 2 }
  0x60   : > { %1862 = vrot.lane.b32.xlu1 %v2555_v4, %s2226_s30  ;;  %v641_v59 = vsel %vm552_vm5, %v638_v46, %v640_v49  ;;  %v646_v7 = vsel %vm593_vm4, %v643_v54, %v645_v61  ;;  %v515_v46 = vld [vmem:[%s2457_s14 + $0x88] sm:$0x3]  ;;  %v579_v54 = vrot.slane %v2683_v45, 1  ;;  %v619_v61 = vrot.slane %v2680_v43, 2 }
  0x61   : > { %1857 = vrot.lane.b32.xlu0 %v2511_v44, %s2226_s30  ;;  %v2631_v63 = vpack.i.bf16 %v641_v59, %v639_v58  ;;  %v2643_v15 = vpack.i.bf16 %v646_v7, %v644_v0  ;;  %v622_v0 = vrot.slane %v515_v46, 2  ;;  %v1981_v7 = vpack.i.bf16 %v2548_v60, %v2534_v55 }
  0x62   : > { %v580_v58 = vsel %vm552_vm5, %v578_v53, %v579_v54 }
  0x63   : > { %v623_v3 = vsel %vm593_vm4, %v620_v62, %v622_v0 }
  0x64   : > { %1872 = vrot.lane.b32.xlu1 %v2511_v44, %s2221_s24  ;;  %v512_v44 = vld [vmem:[%s2457_s14 + $0x70] sm:$0x3] }
  0x65   : > { %1867 = vrot.lane.b32.xlu0 %v2528_v51, %s2227_s7  ;;  %v576_v14 = vrot.slane %v512_v44, 1  ;;  %v617_v37 = vrot.slane %v512_v44, 2  ;;  %v1931_v44 = vpack.i.bf16 %v2683_v45, %v2680_v43 }
  0x67   : > { %v577_v35 = vsel %vm552_vm5, %v574_v41, %v576_v14  ;;  %v618_v41 = vsel %vm593_vm4, %v615_v32, %v617_v37 }
  0x68   : > { %1882 = vrot.lane.b32.xlu1 %v2555_v4, %s2221_s24  ;;  %v1911_v42 = vpack.i.bf16 %v577_v35, %v575_v28 }
  0x69   : > { %1877 = vrot.lane.b32.xlu0 %v2606_v40, %s2227_s7 }
  0x6c   : > { %1892 = vrot.lane.b32.xlu1 %v2606_v40, %s2220_s23 }
  0x6d   : > { %1887 = vrot.lane.b32.xlu0 %v2528_v51, %s2220_s23  ;;  %v616_v51 = vsel %vm593_vm4, %v614_v26, %v615_v32 }
  0x6e   : > { %v1921_v49 = vpack.i.bf16 %v618_v41, %v616_v51 }
  0x70   : > { %1902 = vrot.lane.b32.xlu1 %v1901_v17, %s2222_s29 }
  0x71   : > { %1897 = vrot.lane.b32.xlu0 %v2543_v57, %s2222_s29  ;;  %v581_v57 = vrot.slane %v515_v46, 1 }
  0x73   : > { %v582_v59 = vsel %vm552_vm5, %v579_v54, %v581_v57 }
  0x74   : > { %1912 = vrot.lane.b32.xlu1 %v1911_v42, %s2223_s8 }
  0x75   : > { %1907 = vrot.lane.b32.xlu0 %v2555_v4, %s2223_s8  ;;  %v1941_v4 = vpack.i.bf16 %v582_v59, %v580_v58 }
  0x78   : > { %1922 = vrot.lane.b32.xlu1 %v1921_v49, %s2224_s11 }
  0x79   : > { %1917 = vrot.lane.b32.xlu0 %v2606_v40, %s2224_s11  ;;  %v621_v40 = vsel %vm593_vm4, %v619_v61, %v620_v62 }
  0x7a   : > { %v1956_v6 = vpack.i.bf16 %v623_v3, %v621_v40 }
  0x7c   : > { %1932 = vrot.lane.b32.xlu1 %v1931_v44, %s2225_s13 }
  0x7d   : > { %1927 = vrot.lane.b32.xlu0 %v1901_v17, %s2225_s13 }
  0x80   : > { %1942 = vrot.lane.b32.xlu1 %v1941_v4, %s2226_s30 }
  0x81   : > { %1937 = vrot.lane.b32.xlu0 %v1911_v42, %s2226_s30 }
  0x84   : > { %1952 = vrot.lane.b32.xlu1 %v1911_v42, %s2221_s24 }
  0x85   : > { %1947 = vrot.lane.b32.xlu0 %v1921_v49, %s2227_s7 }
  0x88   : > { %1962 = vrot.lane.b32.xlu1 %v1941_v4, %s2221_s24 }
  0x89   : > { %1957 = vrot.lane.b32.xlu0 %v1956_v6, %s2227_s7 }
  0x8c   : > { %1972 = vrot.lane.b32.xlu1 %v1956_v6, %s2220_s23 }
  0x8d   : > { %1967 = vrot.lane.b32.xlu0 %v1921_v49, %s2220_s23 }
  0x90   : > { %1982 = vrot.lane.b32.xlu1 %v1981_v7, %s2222_s29 }
  0x91   : > { %1977 = vrot.lane.b32.xlu0 %v1931_v44, %s2222_s29 }
  0x94   : > { %1992 = vrot.lane.b32.xlu1 %v2578_v22, %s2223_s8 }
  0x95   : > { %1987 = vrot.lane.b32.xlu0 %v1941_v4, %s2223_s8 }
  0x98   : > { %2002 = vrot.lane.b32.xlu1 %v2589_v30, %s2224_s11 }
  0x99   : > { %1997 = vrot.lane.b32.xlu0 %v1956_v6, %s2224_s11 }
  0x9c   : > { %2012 = vrot.lane.b32.xlu1 %v2011_v10, %s2225_s13 }
  0x9d   : > { %2007 = vrot.lane.b32.xlu0 %v1981_v7, %s2225_s13 }
  0xa0   : > { %2022 = vrot.lane.b32.xlu1 %v2604_v38, %s2226_s30 }
  0xa1   : > { %2017 = vrot.lane.b32.xlu0 %v2578_v22, %s2226_s30 }
  0xa4   : > { %2032 = vrot.lane.b32.xlu1 %v2578_v22, %s2221_s24  ;;  %v2091_v22 = vpack.i.bf16 %v2616_v50, %v2625_v56 }
  0xa5   : > { %2027 = vrot.lane.b32.xlu0 %v2589_v30, %s2227_s7 }
  0xa8   : > { %2042 = vrot.lane.b32.xlu1 %v2604_v38, %s2221_s24 }
  0xa9   : > { %2037 = vrot.lane.b32.xlu0 %v2620_v52, %s2227_s7 }
  0xac   : > { %2052 = vrot.lane.b32.xlu1 %v2620_v52, %s2220_s23 }
  0xad   : > { %2047 = vrot.lane.b32.xlu0 %v2589_v30, %s2220_s23 }
  0xb0   : > { %2062 = vrot.lane.b32.xlu1 %v2061_v11, %s2222_s29 }
  0xb1   : > { %2057 = vrot.lane.b32.xlu0 %v2011_v10, %s2222_s29 }
  0xb4   : > { %2072 = vrot.lane.b32.xlu1 %v2631_v63, %s2223_s8 }
  0xb5   : > { %2067 = vrot.lane.b32.xlu0 %v2604_v38, %s2223_s8 }
  0xb8   : > { %2082 = vrot.lane.b32.xlu1 %v2643_v15, %s2224_s11 }
  0xb9   : > { %2077 = vrot.lane.b32.xlu0 %v2620_v52, %s2224_s11 }
  0xba   : > { %v1813_v30 = vpop.permute.xlu1 %1812 }
  0xbb   : > { %v1798_v31 = vpop.permute.xlu0 %1797  ;;  %v1815_v26 = vunpack.i.h.bf16 %v1813_v30  ;;  %v1814_v27 = vunpack.i.l.bf16 %v1813_v30 }
  0xbc   : > { %2092 = vrot.lane.b32.xlu1 %v2091_v22, %s2225_s13  ;;  %v1800_v16 = vunpack.i.h.bf16 %v1798_v31  ;;  %v1799_v17 = vunpack.i.l.bf16 %v1798_v31 }
  0xbd   : > { %2087 = vrot.lane.b32.xlu0 %v2061_v11, %s2225_s13 }
  0xbe   : > { %v1818_v36 = vpop.permute.xlu1 %1817  ;;  %v1046_v20 = vsel %vm1044_vm7, %v2463_v2, %v1800_v16 }
  0xbf   : > { %v1803_v14 = vpop.permute.xlu0 %1802  ;;  %v1820_v28 = vunpack.i.h.bf16 %v1818_v36  ;;  %v1819_v32 = vunpack.i.l.bf16 %v1818_v36 }
  0xc0   : > { %2102 = vrot.lane.b32.xlu1 %v2101_v33, %s2226_s30  ;;  %v1805_v23 = vunpack.i.h.bf16 %v1803_v14 }
  0xc1   : > { %2097 = vrot.lane.b32.xlu0 %v2631_v63, %s2226_s30  ;;  %v1804_v63 = vunpack.i.l.bf16 %v1803_v14 }
  0xc2   : > { %v1823_v38 = vpop.permute.xlu1 %1822  ;;  %v1048_v34 = vsel %vm1044_vm7, %v2473_v9, %v1805_v23 }
  0xc3   : > { %v1808_v50 = vpop.permute.xlu0 %1807  ;;  %v1047_v35 = vsel %vm1044_vm7, %v2470_v8, %v1804_v63  ;;  %v1825_v37 = vunpack.i.h.bf16 %v1823_v38  ;;  %v1065_v9 = vsel %vm1061_vm8, %v1048_v34, %v1820_v28 }
  0xc4   : > { %2112 = vrot.lane.b32.xlu1 %v2111_v21, %s2227_s7  ;;  %v1824_v21 = vunpack.i.l.bf16 %v1823_v38  ;;  %v1810_v42 = vunpack.i.h.bf16 %v1808_v50  ;;  %v1809_v51 = vunpack.i.l.bf16 %v1808_v50  ;;  %v1064_v41 = vsel %vm1061_vm8, %v1047_v35, %v1819_v32 }
  0xc5   : > { %2107 = vrot.lane.b32.xlu0 %v2643_v15, %s2227_s7  ;;  %v1045_v15 = vsel %vm1044_vm7, %v2460_v1, %v1799_v17  ;;  %v1063_v1 = vsel %vm1061_vm8, %v1046_v20, %v1815_v26  ;;  %v1082_v54 = vsel %vm1078_vm9, %v1065_v9, %v1825_v37 }
  0xc6   : > { %v2770_v52 = vpop.permute.xlu1 %1832  ;;  %v1062_v2 = vsel %vm1061_vm8, %v1045_v15, %v1814_v27  ;;  %v1081_v53 = vsel %vm1078_vm9, %v1064_v41, %v1824_v21  ;;  %v1080_v4 = vsel %vm1078_vm9, %v1063_v1, %v1810_v42 }
  0xc7   : > { %v1828_v56 = vpop.permute.xlu0 %1827  ;;  %v1079_v59 = vsel %vm1078_vm9, %v1062_v2, %v1809_v51  ;;  %v1835_v0 = vunpack.i.h.bf16 %v2770_v52  ;;  %v1834_v40 = vunpack.i.l.bf16 %v2770_v52 }
  0xc8   : > { %v1830_v46 = vunpack.i.h.bf16 %v1828_v56  ;;  %v1829_v49 = vunpack.i.l.bf16 %v1828_v56 }
  0xc9   : > { %v1098_v26 = vsel %vm1095_vm10, %v1081_v53, %v1834_v40  ;;  %v1099_v27 = vsel %vm1095_vm10, %v1082_v54, %v1835_v0 }
  0xca   : > { %v2772_v18 = vpop.permute.xlu1 %1842  ;;  %v1096_v7 = vsel %vm1095_vm10, %v1079_v59, %v1829_v49  ;;  %v1097_v10 = vsel %vm1095_vm10, %v1080_v4, %v1830_v46 }
  0xcb   : > { %v1838_v25 = vpop.permute.xlu0 %1837  ;;  %v1845_v11 = vunpack.i.h.bf16 %v2772_v18  ;;  %v1844_v22 = vunpack.i.l.bf16 %v2772_v18 }
  0xcc   : > { %v1840_v57 = vunpack.i.h.bf16 %v1838_v25  ;;  %v1839_v44 = vunpack.i.l.bf16 %v1838_v25 }
  0xcd   : > { %v1115_v32 = vsel %vm1112_vm11, %v1098_v26, %v1844_v22 }
  0xce   : > { %v2778_v33 = vpop.permute.xlu1 %1852  ;;  %v1113_v31 = vsel %vm1112_vm11, %v1096_v7, %v1839_v44  ;;  %v1114_v36 = vsel %vm1112_vm11, %v1097_v10, %v1840_v57 }
  0xcf   : > { %v1848_v39 = vpop.permute.xlu0 %1847  ;;  %v1855_v14 = vunpack.i.h.bf16 %v2778_v33  ;;  %v1854_v38 = vunpack.i.l.bf16 %v2778_v33  ;;  %v1116_v33 = vsel %vm1112_vm11, %v1099_v27, %v1845_v11 }
  0xd0   : > { %v1850_v61 = vunpack.i.h.bf16 %v1848_v39  ;;  %v1849_v62 = vunpack.i.l.bf16 %v1848_v39 }
  0xd1   : > { %v1132_v37 = vsel %vm1129_vm12, %v1115_v32, %v1854_v38  ;;  %v1133_v21 = vsel %vm1129_vm12, %v1116_v33, %v1855_v14 }
  0xd2   : > { %v1863_v8 = vpop.permute.xlu1 %1862  ;;  %v1130_v52 = vsel %vm1129_vm12, %v1113_v31, %v1849_v62  ;;  %v1131_v56 = vsel %vm1129_vm12, %v1114_v36, %v1850_v61 }
  0xd3   : > { %v1858_v58 = vpop.permute.xlu0 %1857  ;;  %v1865_v23 = vunpack.i.h.bf16 %v1863_v8  ;;  %v1864_v63 = vunpack.i.l.bf16 %v1863_v8 }
  0xd4   : > { %v1860_v3 = vunpack.i.h.bf16 %v1858_v58  ;;  %v1859_v6 = vunpack.i.l.bf16 %v1858_v58 }
  0xd5   : > { %v1149_v51 = vsel %vm1146_vm13, %v1132_v37, %v1864_v63  ;;  %v1150_v2 = vsel %vm1146_vm13, %v1133_v21, %v1865_v23 }
  0xd6   : > { %v1873_v30 = vpop.permute.xlu1 %1872  ;;  %v1147_v18 = vsel %vm1146_vm13, %v1130_v52, %v1859_v6  ;;  %v1148_v25 = vsel %vm1146_vm13, %v1131_v56, %v1860_v3 }
  0xd7   : > { %v1868_v50 = vpop.permute.xlu0 %1867  ;;  %v1875_v61 = vunpack.i.h.bf16 %v1873_v30  ;;  %v1874_v62 = vunpack.i.l.bf16 %v1873_v30 }
  0xd8   : > { %v1870_v16 = vunpack.i.h.bf16 %v1868_v50  ;;  %v1869_v17 = vunpack.i.l.bf16 %v1868_v50 }
  0xd9   : > { %v1050_v50 = vsel %vm1044_vm7, %v2489_v24, %v1875_v61  ;;  %v1049_v30 = vsel %vm1044_vm7, %v2483_v19, %v1874_v62 }
  0xda   : > { %v1883_v20 = vpop.permute.xlu1 %1882  ;;  %v1164_v15 = vsel %vm1163_vm14, %v1147_v18, %v1869_v17  ;;  %v1165_v28 = vsel %vm1163_vm14, %v1148_v25, %v1870_v16 }
  0xdb   : > { %v1878_v34 = vpop.permute.xlu0 %1877  ;;  %v1180_v35 = vpack.c.bf16 %v1165_v28, %v1164_v15  ;;  %v1885_v59 = vunpack.i.h.bf16 %v1883_v20  ;;  %v1884_v4 = vunpack.i.l.bf16 %v1883_v20 }
  0xdc   : > { %v1880_v39 = vunpack.i.h.bf16 %v1878_v34  ;;  %v1879_v42 = vunpack.i.l.bf16 %v1878_v34 }
  0xdd   : > { %1682 = vmatprep.mubr.msk.bf16.mxu0 %vm1215_vm15, %v1180_v35  ;;  %v1052_v31 = vsel %vm1044_vm7, %v2520_v48, %v1885_v59  ;;  %v1051_v36 = vsel %vm1044_vm7, %v2517_v47, %v1884_v4 }
  0xde   : > { %v1166_v1 = vsel %vm1163_vm14, %v1149_v51, %v1879_v42  ;;  %v1167_v41 = vsel %vm1163_vm14, %v1150_v2, %v1880_v39  ;;  %v1893_v9 = vpop.permute.xlu1 %1892 }
  0xdf   : > { %v1181_v46 = vpack.c.bf16 %v1167_v41, %v1166_v1  ;;  %v1888_v49 = vpop.permute.xlu0 %1887  ;;  %v1895_v0 = vunpack.i.h.bf16 %v1893_v9  ;;  %v1894_v40 = vunpack.i.l.bf16 %v1893_v9 }
  0xe0   : > { %v1890_v3 = vunpack.i.h.bf16 %v1888_v49  ;;  %v1889_v6 = vunpack.i.l.bf16 %v1888_v49 }
  0xe1   : > { %1683 = vmatmul.mubr.msk.bf16.vlgmr.msra.gmra.mrb[0].mxu0 %vm1215_vm15, %v1181_v46  ;;  %v1068_v52 = vsel %vm1061_vm8, %v1051_v36, %v1894_v40  ;;  %v1069_v56 = vsel %vm1061_vm8, %v1052_v31, %v1895_v0 }
  0xe2   : > { %v1903_v8 = vpop.permute.xlu1 %1902  ;;  %v1067_v16 = vsel %vm1061_vm8, %v1050_v50, %v1890_v3  ;;  %v1066_v17 = vsel %vm1061_vm8, %v1049_v30, %v1889_v6 }
  0xe3   : > { %v1898_v53 = vpop.permute.xlu0 %1897  ;;  %v1905_v10 = vunpack.i.h.bf16 %v1903_v8  ;;  %v1904_v11 = vunpack.i.l.bf16 %v1903_v8 }
  0xe4   : > { %v1900_v14 = vunpack.i.h.bf16 %v1898_v53  ;;  %v1899_v38 = vunpack.i.l.bf16 %v1898_v53 }
  0xe5   : > { %v1085_v47 = vsel %vm1078_vm9, %v1068_v52, %v1904_v11  ;;  %v1086_v18 = vsel %vm1078_vm9, %v1069_v56, %v1905_v10 }
  0xe6   : > { %v2820_v54 = vpop.permute.xlu1 %1912  ;;  %v1083_v19 = vsel %vm1078_vm9, %v1066_v17, %v1899_v38  ;;  %v1084_v27 = vsel %vm1078_vm9, %v1067_v16, %v1900_v14 }
  0xe7   : > { %v1908_v57 = vpop.permute.xlu0 %1907  ;;  %v1915_v28 = vunpack.i.h.bf16 %v2820_v54  ;;  %v1914_v32 = vunpack.i.l.bf16 %v2820_v54 }
  0xe8   : > { %v1910_v48 = vunpack.i.h.bf16 %v1908_v57  ;;  %v1909_v23 = vunpack.i.l.bf16 %v1908_v57 }
  0xe9   : > { %v1102_v59 = vsel %vm1095_vm10, %v1085_v47, %v1914_v32  ;;  %v1103_v4 = vsel %vm1095_vm10, %v1086_v18, %v1915_v28 }
  0xea   : > { %v2822_v44 = vpop.permute.xlu1 %1922  ;;  %v1100_v35 = vsel %vm1095_vm10, %v1083_v19, %v1909_v23  ;;  %v1101_v37 = vsel %vm1095_vm10, %v1084_v27, %v1910_v48 }
  0xeb   : > { %v1918_v58 = vpop.permute.xlu0 %1917  ;;  %v1925_v21 = vunpack.i.h.bf16 %v2822_v44  ;;  %v1924_v39 = vunpack.i.l.bf16 %v2822_v44 }
  0xec   : > { %v1920_v25 = vunpack.i.h.bf16 %v1918_v58  ;;  %v1919_v24 = vunpack.i.l.bf16 %v1918_v58 }
  0xed   : > { %v1119_v40 = vsel %vm1112_vm11, %v1102_v59, %v1924_v39  ;;  %v1120_v3 = vsel %vm1112_vm11, %v1103_v4, %v1925_v21 }
  0xee   : > { %v1933_v7 = vpop.permute.xlu1 %1932  ;;  %v1117_v51 = vsel %vm1112_vm11, %v1100_v35, %v1919_v24  ;;  %v1118_v2 = vsel %vm1112_vm11, %v1101_v37, %v1920_v25 }
  0xef   : > { %v1928_v22 = vpop.permute.xlu0 %1927  ;;  %v1935_v1 = vunpack.i.h.bf16 %v1933_v7  ;;  %v1934_v41 = vunpack.i.l.bf16 %v1933_v7 }
  0xf0   : > { %v1930_v20 = vunpack.i.h.bf16 %v1928_v22  ;;  %v1929_v15 = vunpack.i.l.bf16 %v1928_v22 }
  0xf1   : > { %v1136_v10 = vsel %vm1129_vm12, %v1119_v40, %v1934_v41  ;;  %v1137_v11 = vsel %vm1129_vm12, %v1120_v3, %v1935_v1 }
  0xf2   : > { %v1943_v63 = vpop.permute.xlu1 %1942  ;;  %v1134_v46 = vsel %vm1129_vm12, %v1117_v51, %v1929_v15  ;;  %v1135_v49 = vsel %vm1129_vm12, %v1118_v2, %v1930_v20 }
  0xf3   : > { %v1938_v26 = vpop.permute.xlu0 %1937  ;;  %v1945_v54 = vunpack.i.h.bf16 %v1943_v63  ;;  %v1944_v57 = vunpack.i.l.bf16 %v1943_v63 }
  0xf4   : > { %v1940_v33 = vunpack.i.h.bf16 %v1938_v26  ;;  %v1939_v34 = vunpack.i.l.bf16 %v1938_v26 }
  0xf5   : > { %v1153_v36 = vsel %vm1146_vm13, %v1136_v10, %v1944_v57  ;;  %v1154_v14 = vsel %vm1146_vm13, %v1137_v11, %v1945_v54 }
  0xf6   : > { %v1953_v42 = vpop.permute.xlu1 %1952  ;;  %v1151_v58 = vsel %vm1146_vm13, %v1134_v46, %v1939_v34  ;;  %v1152_v44 = vsel %vm1146_vm13, %v1135_v49, %v1940_v33 }
  0xf7   : > { %v1948_v9 = vpop.permute.xlu0 %1947  ;;  %v1955_v24 = vunpack.i.h.bf16 %v1953_v42  ;;  %v1954_v26 = vunpack.i.l.bf16 %v1953_v42 }
  0xf8   : > { %v1950_v8 = vunpack.i.h.bf16 %v1948_v9  ;;  %v1949_v53 = vunpack.i.l.bf16 %v1948_v9 }
  0xf9   : > { %v1054_v51 = vsel %vm1044_vm7, %v2587_v29, %v1955_v24  ;;  %v1053_v42 = vsel %vm1044_vm7, %v2558_v5, %v1954_v26 }
  0xfa   : > { %v1168_v61 = vsel %vm1163_vm14, %v1151_v58, %v1949_v53  ;;  %v1169_v62 = vsel %vm1163_vm14, %v1152_v44, %v1950_v8  ;;  %v1963_v0 = vpop.permute.xlu1 %1962 }
  0xfb   : > { %v1182_v6 = vpack.c.bf16 %v1169_v62, %v1168_v61  ;;  %v1958_v7 = vpop.permute.xlu0 %1957  ;;  %v1965_v18 = vunpack.i.h.bf16 %v1963_v0  ;;  %v1964_v25 = vunpack.i.l.bf16 %v1963_v0 }
  0xfc   : > { %v1960_v22 = vunpack.i.h.bf16 %v1958_v7  ;;  %v1959_v31 = vunpack.i.l.bf16 %v1958_v7 }
  0xfd   : > { %1686 = vmatprep.mubr.msk.bf16.mxu0 %vm1215_vm15, %v1182_v6  ;;  %v1056_v35 = vsel %vm1044_vm7, %v2683_v45, %v1965_v18  ;;  %v1055_v37 = vsel %vm1044_vm7, %v2680_v43, %v1964_v25 }
  0xfe   : > { %v1171_v38 = vsel %vm1163_vm14, %v1154_v14, %v1960_v22  ;;  %v1170_v50 = vsel %vm1163_vm14, %v1153_v36, %v1959_v31  ;;  %v1973_v30 = vpop.permute.xlu1 %1972 }
  0xff   : > { %v1183_v52 = vpack.c.bf16 %v1171_v38, %v1170_v50  ;;  %v1968_v56 = vpop.permute.xlu0 %1967  ;;  %v1975_v19 = vunpack.i.h.bf16 %v1973_v30  ;;  %v1974_v27 = vunpack.i.l.bf16 %v1973_v30 }
 0x100   : > { %v1970_v20 = vunpack.i.h.bf16 %v1968_v56  ;;  %v1969_v15 = vunpack.i.l.bf16 %v1968_v56 }
 0x101   : > { %1687 = vmatmul.mubr.msk.bf16.gmra.mrb[4].mxu0 %vm1215_vm15, %v1183_v52  ;;  %v1072_v2 = vsel %vm1061_vm8, %v1055_v37, %v1974_v27  ;;  %v1073_v1 = vsel %vm1061_vm8, %v1056_v35, %v1975_v19 }
 0x102   : > { %v1983_v16 = vpop.permute.xlu1 %1982  ;;  %v1071_v41 = vsel %vm1061_vm8, %v1054_v51, %v1970_v20  ;;  %v1070_v9 = vsel %vm1061_vm8, %v1053_v42, %v1969_v15 }
 0x103   : > { %v1978_v17 = vpop.permute.xlu0 %1977  ;;  %v1985_v32 = vunpack.i.h.bf16 %v1983_v16  ;;  %v1984_v33 = vunpack.i.l.bf16 %v1983_v16 }
 0x104   : > { %v1980_v21 = vunpack.i.h.bf16 %v1978_v17  ;;  %v1979_v39 = vunpack.i.l.bf16 %v1978_v17 }
 0x105   : > { %v1089_v43 = vsel %vm1078_vm9, %v1072_v2, %v1984_v33  ;;  %v1090_v8 = vsel %vm1078_vm9, %v1073_v1, %v1985_v32 }
 0x106   : > { %v2866_v48 = vpop.permute.xlu1 %1992  ;;  %v1087_v5 = vsel %vm1078_vm9, %v1070_v9, %v1979_v39  ;;  %v1088_v57 = vsel %vm1078_vm9, %v1071_v41, %v1980_v21 }
 0x107   : > { %v1988_v23 = vpop.permute.xlu0 %1987  ;;  %v1995_v59 = vunpack.i.h.bf16 %v2866_v48  ;;  %v1994_v4 = vunpack.i.l.bf16 %v2866_v48 }
 0x108   : > { %v1990_v45 = vunpack.i.h.bf16 %v1988_v23  ;;  %v1989_v46 = vunpack.i.l.bf16 %v1988_v23 }
 0x109   : > { %v1106_v48 = vsel %vm1095_vm10, %v1089_v43, %v1994_v4  ;;  %v1107_v23 = vsel %vm1095_vm10, %v1090_v8, %v1995_v59 }
 0x10a   : > { %v2868_v63 = vpop.permute.xlu1 %2002  ;;  %v1104_v0 = vsel %vm1095_vm10, %v1087_v5, %v1989_v46  ;;  %v1105_v40 = vsel %vm1095_vm10, %v1088_v57, %v1990_v45 }
 0x10b   : > { %v1998_v47 = vpop.permute.xlu0 %1997  ;;  %v2005_v3 = vunpack.i.h.bf16 %v2868_v63  ;;  %v2004_v6 = vunpack.i.l.bf16 %v2868_v63 }
 0x10c   : > { %v2000_v53 = vunpack.i.h.bf16 %v1998_v47  ;;  %v1999_v29 = vunpack.i.l.bf16 %v1998_v47 }
 0x10d   : > { %v1123_v25 = vsel %vm1112_vm11, %v1106_v48, %v2004_v6  ;;  %v1124_v24 = vsel %vm1112_vm11, %v1107_v23, %v2005_v3 }
 0x10e   : > { %v2013_v28 = vpop.permute.xlu1 %2012  ;;  %v1121_v10 = vsel %vm1112_vm11, %v1104_v0, %v1999_v29  ;;  %v1122_v11 = vsel %vm1112_vm11, %v1105_v40, %v2000_v53 }
 0x10f   : > { %v2008_v34 = vpop.permute.xlu0 %2007  ;;  %v2015_v22 = vunpack.i.h.bf16 %v2013_v28  ;;  %v2014_v31 = vunpack.i.l.bf16 %v2013_v28 }
 0x110   : > { %v2010_v58 = vunpack.i.h.bf16 %v2008_v34  ;;  %v2009_v44 = vunpack.i.l.bf16 %v2008_v34 }
 0x111   : > { %v1140_v27 = vsel %vm1129_vm12, %v1123_v25, %v2014_v31  ;;  %v1141_v20 = vsel %vm1129_vm12, %v1124_v24, %v2015_v22 }
 0x112   : > { %v2023_v49 = vpop.permute.xlu1 %2022  ;;  %v1138_v14 = vsel %vm1129_vm12, %v1121_v10, %v2009_v44  ;;  %v1139_v38 = vsel %vm1129_vm12, %v1122_v11, %v2010_v58 }
 0x113   : > { %v2018_v54 = vpop.permute.xlu0 %2017  ;;  %v2025_v52 = vunpack.i.h.bf16 %v2023_v49  ;;  %v2024_v56 = vunpack.i.l.bf16 %v2023_v49 }
 0x114   : > { %v2020_v61 = vunpack.i.h.bf16 %v2018_v54  ;;  %v2019_v62 = vunpack.i.l.bf16 %v2018_v54 }
 0x115   : > { %v1157_v32 = vsel %vm1146_vm13, %v1140_v27, %v2024_v56  ;;  %v1158_v33 = vsel %vm1146_vm13, %v1141_v20, %v2025_v52 }
 0x116   : > { %v2033_v7 = vpop.permute.xlu1 %2032  ;;  %v1155_v16 = vsel %vm1146_vm13, %v1138_v14, %v2019_v62  ;;  %v1156_v17 = vsel %vm1146_vm13, %v1139_v38, %v2020_v61 }
 0x117   : > { %v2028_v36 = vpop.permute.xlu0 %2027  ;;  %v2035_v45 = vunpack.i.h.bf16 %v2033_v7  ;;  %v2034_v46 = vunpack.i.l.bf16 %v2033_v7 }
 0x118   : > { %v2030_v50 = vunpack.i.h.bf16 %v2028_v36  ;;  %v2029_v30 = vunpack.i.l.bf16 %v2028_v36 }
 0x119   : > { %v1058_v61 = vsel %vm1044_vm7, %v2548_v60, %v2035_v45  ;;  %v1057_v62 = vsel %vm1044_vm7, %v2534_v55, %v2034_v46 }
 0x11a   : > { %v2043_v63 = vpop.permute.xlu1 %2042  ;;  %v1172_v47 = vsel %vm1163_vm14, %v1155_v16, %v2029_v30  ;;  %v1173_v18 = vsel %vm1163_vm14, %v1156_v17, %v2030_v50 }
 0x11b   : > { %v2038_v26 = vpop.permute.xlu0 %2037  ;;  %v1184_v19 = vpack.c.bf16 %v1173_v18, %v1172_v47  ;;  %v2045_v41 = vunpack.i.h.bf16 %v2043_v63  ;;  %v2044_v9 = vunpack.i.l.bf16 %v2043_v63 }
 0x11c   : > { %v2040_v15 = vunpack.i.h.bf16 %v2038_v26  ;;  %v2039_v28 = vunpack.i.l.bf16 %v2038_v26 }
 0x11d   : > { %1690 = vmatprep.mubr.msk.bf16.mxu1 %vm1215_vm15, %v1184_v19  ;;  %v1060_v58 = vsel %vm1044_vm7, %v2569_v13, %v2045_v41  ;;  %v1059_v44 = vsel %vm1044_vm7, %v2566_v12, %v2044_v9 }
 0x11e   : > { %v1175_v34 = vsel %vm1163_vm14, %v1158_v33, %v2040_v15  ;;  %v1174_v35 = vsel %vm1163_vm14, %v1157_v32, %v2039_v28  ;;  %v2053_v37 = vpop.permute.xlu1 %2052 }
 0x11f   : > { %v1185_v21 = vpack.c.bf16 %v1175_v34, %v1174_v35  ;;  %v2048_v39 = vpop.permute.xlu0 %2047  ;;  %v2055_v49 = vunpack.i.h.bf16 %v2053_v37  ;;  %v2054_v43 = vunpack.i.l.bf16 %v2053_v37 }
 0x120   : > { %v2050_v53 = vunpack.i.h.bf16 %v2048_v39  ;;  %v2049_v29 = vunpack.i.l.bf16 %v2048_v39 }
 0x121   : > { %1691 = vmatmul.mubr.msk.bf16.vlgmr.msra.gmra.mrb[0].mxu1 %vm1215_vm15, %v1185_v21  ;;  %v1076_v0 = vsel %vm1061_vm8, %v1059_v44, %v2054_v43  ;;  %v1077_v40 = vsel %vm1061_vm8, %v1060_v58, %v2055_v49 }
 0x122   : > { %v2063_v51 = vpop.permute.xlu1 %2062  ;;  %v1075_v6 = vsel %vm1061_vm8, %v1058_v61, %v2050_v53  ;;  %v1074_v13 = vsel %vm1061_vm8, %v1057_v62, %v2049_v29 }
 0x123   : > { %v2058_v42 = vpop.permute.xlu0 %2057  ;;  %v2065_v5 = vunpack.i.h.bf16 %v2063_v51  ;;  %v2064_v57 = vunpack.i.l.bf16 %v2063_v51 }
 0x124   : > { %v2060_v59 = vunpack.i.h.bf16 %v2058_v42  ;;  %v2059_v4 = vunpack.i.l.bf16 %v2058_v42 }
 0x125   : > { %v1093_v11 = vsel %vm1078_vm9, %v1076_v0, %v2064_v57  ;;  %v1094_v22 = vsel %vm1078_vm9, %v1077_v40, %v2065_v5  ;;  %v2953_v5 = vld [vmem:[%s3052_s2] ss:$0 sm:$0xff] }
 0x126   : > { %v2073_v2 = vpop.permute.xlu1 %2072  ;;  %v1091_v55 = vsel %vm1078_vm9, %v1074_v13, %v2059_v4  ;;  %v1092_v36 = vsel %vm1078_vm9, %v1075_v6, %v2060_v59 }
 0x127   : > { %v2068_v1 = vpop.permute.xlu0 %2067  ;;  %v2075_v7 = vunpack.i.h.bf16 %v2073_v2  ;;  %v2074_v10 = vunpack.i.l.bf16 %v2073_v2 }
 0x128   : > { %v2070_v60 = vunpack.i.h.bf16 %v2068_v1  ;;  %v2069_v31 = vunpack.i.l.bf16 %v2068_v1 }
 0x129   : > { %v1110_v17 = vsel %vm1095_vm10, %v1093_v11, %v2074_v10  ;;  %v1111_v48 = vsel %vm1095_vm10, %v1094_v22, %v2075_v7 }
 0x12a   : > { %v2083_v8 = vpop.permute.xlu1 %2082  ;;  %v1108_v18 = vsel %vm1095_vm10, %v1091_v55, %v2069_v31  ;;  %v1109_v25 = vsel %vm1095_vm10, %v1092_v36, %v2070_v60 }
 0x12b   : > { %v2078_v54 = vpop.permute.xlu0 %2077  ;;  %v2085_v14 = vunpack.i.h.bf16 %v2083_v8  ;;  %v2084_v38 = vunpack.i.l.bf16 %v2083_v8 }
 0x12c   : > { %v2080_v50 = vunpack.i.h.bf16 %v2078_v54  ;;  %v2079_v30 = vunpack.i.l.bf16 %v2078_v54 }
 0x12d   : > { %v1127_v19 = vsel %vm1112_vm11, %v1110_v17, %v2084_v38  ;;  %v1128_v27 = vsel %vm1112_vm11, %v1111_v48, %v2085_v14 }
 0x12e   : > { %v2093_v3 = vpop.permute.xlu1 %2092  ;;  %v1125_v28 = vsel %vm1112_vm11, %v1108_v18, %v2079_v30  ;;  %v1126_v32 = vsel %vm1112_vm11, %v1109_v25, %v2080_v50 }
 0x12f   : > { %v2088_v12 = vpop.permute.xlu0 %2087  ;;  %v2095_v52 = vunpack.i.h.bf16 %v2093_v3  ;;  %v2094_v56 = vunpack.i.l.bf16 %v2093_v3 }
 0x130   : > { %v2090_v23 = vunpack.i.h.bf16 %v2088_v12  ;;  %v2089_v63 = vunpack.i.l.bf16 %v2088_v12 }
 0x131   : > { %v1144_v33 = vsel %vm1129_vm12, %v1127_v19, %v2094_v56  ;;  %v1145_v34 = vsel %vm1129_vm12, %v1128_v27, %v2095_v52 }
 0x132   : > { %v2103_v16 = vpop.permute.xlu1 %2102  ;;  %v1142_v37 = vsel %vm1129_vm12, %v1125_v28, %v2089_v63  ;;  %v1143_v21 = vsel %vm1129_vm12, %v1126_v32, %v2090_v23 }
 0x133   : > { %v2098_v47 = vpop.permute.xlu0 %2097  ;;  %v2105_v24 = vunpack.i.h.bf16 %v2103_v16  ;;  %v2104_v26 = vunpack.i.l.bf16 %v2103_v16 }
 0x134   : > { %v2100_v20 = vunpack.i.h.bf16 %v2098_v47  ;;  %v2099_v15 = vunpack.i.l.bf16 %v2098_v47 }
 0x135   : > { %v1161_v2 = vsel %vm1146_vm13, %v1144_v33, %v2104_v26  ;;  %v1162_v1 = vsel %vm1146_vm13, %v1145_v34, %v2105_v24 }
 0x136   : > { %v2113_v35 = vpop.permute.xlu1 %2112  ;;  %v1159_v45 = vsel %vm1146_vm13, %v1142_v37, %v2099_v15  ;;  %v1160_v46 = vsel %vm1146_vm13, %v1143_v21, %v2100_v20 }
 0x137   : > { %v2115_v39 = vunpack.i.h.bf16 %v2113_v35  ;;  %v2114_v51 = vunpack.i.l.bf16 %v2113_v35  ;;  %v2108_v42 = vpop.permute.xlu0 %2107 }
 0x138   : > { %v2110_v41 = vunpack.i.h.bf16 %v2108_v42  ;;  %v2109_v9 = vunpack.i.l.bf16 %v2108_v42 }
 0x139   : > { %v1178_v49 = vsel %vm1163_vm14, %v1161_v2, %v2114_v51  ;;  %v1179_v43 = vsel %vm1163_vm14, %v1162_v1, %v2115_v39 }
 0x13a   : > { %v1187_v8 = vpack.c.bf16 %v1179_v43, %v1178_v49  ;;  %v1176_v53 = vsel %vm1163_vm14, %v1159_v45, %v2109_v9  ;;  %v1177_v29 = vsel %vm1163_vm14, %v1160_v46, %v2110_v41 }
 0x13b   : > { %v1186_v54 = vpack.c.bf16 %v1177_v29, %v1176_v53 }
 0x13d   : > { %1694 = vmatprep.mubr.msk.bf16.mxu1 %vm1215_vm15, %v1186_v54 }
 0x13e   : > { %1695 = vmatmul.mubr.msk.bf16.gmra.mrb[4].mxu1 %vm1215_vm15, %v1187_v8 }
 0x1b4   : > { %v1684_v57 = vpop.f32.mrb[0].mxu0 }
 0x1b5   : > { %v1278_v58 = vpop.f32.mrb[1].mxu0  ;;  %v1287_v44 = vadd.f32 %v1684_v57, %v2953_v5 }
 0x1b6   : > { %v1279_v59 = vadd.f32 %v2953_v5, %v1278_v58  ;;  %v1685_v4 = vpop.f32.mrb[2].mxu0 }
 0x1b7   : > { %v1281_v61 = vpop.f32.mrb[3].mxu0  ;;  %v1290_v0 = vadd.f32 %v1685_v4, %v2953_v5  ;;  %v1343_v3 = vmax.f32 %v1287_v44, 0.0 }
 0x1b8   : > { %v1341_v62 = vmax.f32 %v1279_v59, 0.0  ;;  %v1282_v40 = vadd.f32 %v2953_v5, %v1281_v61 }
 0x1b9   : > { %v1344_v7 = vmax.f32 %v1290_v0, 0.0  ;;  %v1361_v11 = vsel %vm1163_vm14, %v1343_v3, 0.0 }
 0x1ba   : > { %v1342_v6 = vmax.f32 %v1282_v40, 0.0  ;;  %v1358_v13 = vsel %vm1163_vm14, %v1341_v62, 0.0 }
 0x1bb   : > { %v1363_v60 = vsel %vm1163_vm14, %v1344_v7, 0.0 }
 0x1bc   : > { %v1359_v10 = vsel %vm1163_vm14, %v1342_v6, 0.0 }
 0x1bd   : > { %v1360_v12 = vadd.f32 %v1359_v10, %v1358_v13 }
 0x1bf   : > { %v1362_v22 = vadd.f32 %v1361_v11, %v1360_v12 }
 0x1c1   : > { %v1364_v31 = vadd.f32 %v1363_v60, %v1362_v22 }
 0x1d4   : > { %v1688_v55 = vpop.f32.mrb[4].mxu0 }
 0x1d5   : > { %v1294_v36 = vpop.f32.mrb[5].mxu0  ;;  %v1303_v14 = vadd.f32 %v1688_v55, %v2953_v5 }
 0x1d6   : > { %v1295_v38 = vadd.f32 %v2953_v5, %v1294_v36  ;;  %v1689_v50 = vpop.f32.mrb[6].mxu0  ;;  %v1357_v36 = vld [vmem:[#allocation3] sm:$0x1] }
 0x1d7   : > { %v1297_v30 = vpop.f32.mrb[7].mxu0  ;;  %v1306_v56 = vadd.f32 %v1689_v50, %v2953_v5  ;;  %v1347_v17 = vmax.f32 %v1303_v14, 0.0 }
 0x1d8   : > { %v1345_v52 = vmax.f32 %v1295_v38, 0.0  ;;  %v1298_v16 = vadd.f32 %v2953_v5, %v1297_v30 }
 0x1d9   : > { %v1348_v47 = vmax.f32 %v1306_v56, 0.0  ;;  %v1369_v24 = vsel %vm1163_vm14, %v1347_v17, 0.0  ;;  %v2228_v17 = vmov (!%p1575_p0), 0.0  }
 0x1da   : > { %v1365_v48 = vsel %vm1163_vm14, %v1345_v52, 0.0  ;;  %v1346_v23 = vmax.f32 %v1298_v16, 0.0  ;;  %v2119_v16 = vld [vmem:[%s3053_s3] sm:$0xff] (!%p1575_p0)   ;;  %1698 = vmatprep.subr.bf16.mxu0 (!%p1575_p0), %v2228_v17  ;;  %1702 = vmatprep.mubr.msk.bf16.mxu0 (!%p1575_p0), %vm2229_vm1, %v2228_v17 }
 0x1db   : > { %v1366_v63 = vadd.f32 %v1365_v48, %v1364_v31  ;;  %v1371_v19 = vsel %vm1163_vm14, %v1348_v47, 0.0  ;;  %1699 = vmatpush3.bf16.msra.mxu0 (!%p1575_p0), %v2119_v16  ;;  %v2120_v48 = vld [vmem:[%s3053_s3 + $0x8] sm:$0xff] (!%p1575_p0)  }
 0x1dc   : > { %v1367_v18 = vsel %vm1163_vm14, %v1346_v23, 0.0  ;;  %1700 = vmatprep.subr.bf16.mxu0 (!%p1575_p0), %v2228_v17 }
 0x1dd   : > { %v1368_v25 = vadd.f32 %v1367_v18, %v1366_v63 }
 0x1df   : > { %v1370_v26 = vadd.f32 %v1369_v24, %v1368_v25  ;;  %1701 = vmatpush3.bf16.msra.mxu0 (!%p1575_p0), %v2120_v48 }
 0x1e1   : > { %v1372_v27 = vadd.f32 %v1371_v19, %v1370_v26 }
 0x1f4   : > { %v1692_v20 = vpop.f32.mrb[0].mxu1 }
 0x1f5   : > { %v1310_v15 = vpop.f32.mrb[1].mxu1  ;;  %v1319_v28 = vadd.f32 %v1692_v20, %v2953_v5 }
 0x1f6   : > { %v1311_v32 = vadd.f32 %v2953_v5, %v1310_v15  ;;  %v1693_v33 = vpop.f32.mrb[2].mxu1 }
 0x1f7   : > { %v1313_v34 = vpop.f32.mrb[3].mxu1  ;;  %v1322_v37 = vadd.f32 %v1693_v33, %v2953_v5  ;;  %v1351_v39 = vmax.f32 %v1319_v28, 0.0 }
 0x1f8   : > { %v1349_v35 = vmax.f32 %v1311_v32, 0.0  ;;  %v1314_v21 = vadd.f32 %v2953_v5, %v1313_v34 }
 0x1f9   : > { %v1352_v1 = vmax.f32 %v1322_v37, 0.0  ;;  %v1377_v45 = vsel %vm1163_vm14, %v1351_v39, 0.0 }
 0x1fa   : > { %v1373_v51 = vsel %vm1163_vm14, %v1349_v35, 0.0  ;;  %v1350_v42 = vmax.f32 %v1314_v21, 0.0 }
 0x1fb   : > { %v1374_v2 = vadd.f32 %v1373_v51, %v1372_v27  ;;  %v1379_v49 = vsel %vm1163_vm14, %v1352_v1, 0.0 }
 0x1fc   : > { %v1375_v41 = vsel %vm1163_vm14, %v1350_v42, 0.0 }
 0x1fd   : > { %v1376_v9 = vadd.f32 %v1375_v41, %v1374_v2 }
 0x1ff   : > { %v1378_v46 = vadd.f32 %v1377_v45, %v1376_v9 }
 0x201   : > { %v1380_v43 = vadd.f32 %v1379_v49, %v1378_v46 }
 0x211   : > { %v1696_v8 = vpop.f32.mrb[4].mxu1 }
 0x212   : > { %v1326_v53 = vpop.f32.mrb[5].mxu1  ;;  %v1335_v29 = vadd.f32 %v1696_v8, %v2953_v5 }
 0x213   : > { %v1327_v54 = vadd.f32 %v2953_v5, %v1326_v53  ;;  %v1697_v57 = vpop.f32.mrb[6].mxu1 }
 0x214   : > { %v1329_v58 = vpop.f32.mrb[7].mxu1  ;;  %v1338_v59 = vadd.f32 %v1697_v57, %v2953_v5  ;;  %v1355_v61 = vmax.f32 %v1335_v29, 0.0 }
 0x215   : > { %v1353_v44 = vmax.f32 %v1327_v54, 0.0  ;;  %v1330_v4 = vadd.f32 %v2953_v5, %v1329_v58 }
 0x216   : > { %v1356_v3 = vmax.f32 %v1338_v59, 0.0  ;;  %v1385_v7 = vsel %vm1163_vm14, %v1355_v61, 0.0 }
 0x217   : > { %v1381_v62 = vsel %vm1163_vm14, %v1353_v44, 0.0  ;;  %v1354_v0 = vmax.f32 %v1330_v4, 0.0 }
 0x218   : > { %v1382_v40 = vadd.f32 %v1381_v62, %v1380_v43  ;;  %v1387_v12 = vsel %vm1163_vm14, %v1356_v3, 0.0 }
 0x219   : > { %v1383_v6 = vsel %vm1163_vm14, %v1354_v0, 0.0 }
 0x21a   : > { %v1384_v13 = vadd.f32 %v1383_v6, %v1382_v40 }
 0x21c   : > { %v1386_v10 = vadd.f32 %v1385_v7, %v1384_v13 }
 0x21e   : > { %v1388_v11 = vadd.f32 %v1387_v12, %v1386_v10 }
 0x220   : > { %v1389_v22 = vrot.slane %v1388_v11, 4 }
 0x222   : > { %v1390_v60 = vadd.f32 %v1389_v22, %v1388_v11 }
 0x224   : > { %v1391_v31 = vrot.slane %v1390_v60, 2 }
 0x226   : > { %v1392_v55 = vadd.f32 %v1391_v31, %v1390_v60 }
 0x228   : > { %v1393_v5 = vrot.slane %v1392_v55, 1  ;;  %1401 = sbr.rel (%p1575_p0) target bundleno = 945 (0x3b1), region = 44 }
 0x22a   : > { %v1394_v14 = vadd.f32 %v1393_v5, %v1392_v55 }
 0x22c   : > { %v1395_v38 = vadd.f32 %v1394_v14, %v1357_v36 }
 0x22e   : > { %1397 = vst.msk [vmem:[#allocation3] sm:$0x1] %vm1396_vm0, %v1395_v38 }
 0x235   : > { %v1402_v50 = vld [vmem:[#allocation3] sm:$0x1] }
 0x236   : > { %v1403_v30 = vmul.f32 0.00390625, %v1402_v50 }
 0x238   : > { %v1404_v52 = vmul.f32 %v1403_v30, %v1403_v30 }
 0x23a   : > { %v1405_v56 = vsel %vm1396_vm0, %v1404_v52, 0.0 }
 0x23b   : > { %1406 = vadd.xlane.f32.xlu0 %v1405_v56 }
 0x2c8   : > { %v1407_v23 = vpop.xlane.xlu0 %1406 }
 0x2c9   : > { %v1408_v63 = vmax.f32 %v1407_v23, 1e-24 }
 0x2cb   : > { %2121 = vrsqrt.f32 %v1408_v63 }
 0x2d5   : > { %v2122_v47 = vpop.eup %2121 }
 0x2d6   : > { %v1410_v18 = vmul.f32 %v2122_v47, %v1403_v30 }
 0x2d8   : > { %v1411_v25 = vpack.c.bf16 %v1410_v18, %v1410_v18 }
 0x2da   : > { %1703 = vmatmul.mubr.msk.bf16.vlgmr.msra.gmra.mrb[0].mxu0 %vm1163_vm14, %v1411_v25 }
 0x3ad   : > { %v1465_v24 = vpop.f32.mrb[0].mxu0 }
 0x3ae   : > { %1471 = vst [vmem:[%s2335_s12] sm:$0x1] %v1465_v24  ;;  %v1704_v26 = vpop.f32.mrb[1].mxu0 }
 0x3af   : > { %v1468_v19 = vpop.f32.mrb[2].mxu0 }
 0x3b0   : > { %v1705_v27 = vpop.f32.mrb[3].mxu0 }
 0x3b1 PF: > { %s1579_s18 = sshll.u32 %s2205_s19, 4  ;;  %s1485_s9 = sshll.u32 %s2335_s12, 4  ;;  %s1486_s9 = int_to_ptr.vmem [resolvable:$true] %s1485_s9 }
 0x3b2   : > { %s3000_s7 = scalar_lea.hbm %s3054_s4, %s1579_s18  ;;  %s1473_s10 = scalar_lea.sflag [#allocation5], %s200_s6 }
 0x3b3   : > { %s2123_s14 = scalar_lea.vmem %s1486_s9, 16  ;;  %s2230_s23 = smov [#allocation4]  }
 0x3b4   : > { %p2124_p1 = scmp.ne.s32.totalorder %s1486_s9, %s2123_s14  ;;  %s2127_s24 = sshll.u32 %s2230_s23, 4  ;;  %s2128_s24 = int_to_ptr.vmem [resolvable:$false] %s2127_s24 }
 0x3b5   : > { %s2129_s29 = scalar_lea.vmem %s2128_s24, 32  ;;  %p2130_p5 = scmp.lt.s32.totalorder %s1486_s9, %s2128_s24 }
 0x3b6   : > { %p2125_p2 = pnand %p2124_p1, %p2305_p3  ;;  %p2131_p6 = scmp.lt.s32.totalorder %s2129_s29, %s2123_s14 }
 0x3b8   : > { %p2126_p4 = pneg %p2125_p2  ;;  %p2132_p7 = por %p2131_p6, %p2130_p5 }
 0x3ba   : > { %p2133_p8 = pnand %p2132_p7, %p2126_p4 }
 0x3bc   : > { %2136 = shalt.err (!%p2133_p8)
}
 0x3bd   : > { %s2137_s19 = scalar_lea.hbm %s3000_s7, 16  ;;  %s2141_s8 = scalar_lea.hbm %s3054_s4, 32 }
 0x3be   : > { %p2138_p10 = scmp.ne.s32.totalorder %s3000_s7, %s2137_s19  ;;  %p2142_p13 = scmp.lt.u32.totalorder %s3000_s7, %s3054_s4 }
 0x3bf   : > { %p2143_p0 = scmp.lt.u32.totalorder %s2141_s8, %s2137_s19  ;;  %p2145_p2 = scmp.lt.u32.totalorder %s2137_s19, %s3000_s7 }
 0x3c0   : > { %p2139_p11 = pnand %p2138_p10, %p2305_p3 }
 0x3c1   : > { %p2144_p1 = por %p2143_p0, %p2142_p13 }
 0x3c2   : > { %p2140_p12 = pneg %p2139_p11 }
 0x3c3   : > { %p2146_p4 = por %p2145_p2, %p2144_p1 }
 0x3c5   : > { %p2147_p5 = pnand %p2146_p4, %p2140_p12 }
 0x3c7   : > { %2150 = shalt.err (!%p2147_p5)
}
 0x3c8   : > { %1714 = dma.vmem_to_hbm [thread:$0]  (%p2305_p3), %s1486_s9, 16, %s3000_s7, %s1473_s10  }
 0x3c9 PF: > { %p1720_p6 = scmp.ge.s32.totalorder %s2217_s22, 2  ;;  %s1497_s13 = sand.u32 1, %s2189_s15  }
 0x3ca   : > { %s1498_s30 = scalar_lea.sflag [#allocation5], %s1497_s13 }
 0x3cb   : > { %p1717_p7 = pnand %p1720_p6, %p2315_p9 }
 0x3cd   : > { %2184 = dma.done.wait (!%p1717_p7), %s1498_s30, 16  }
 0x3ce   : > { %2186 = vsyncadd (!%p1717_p7), %s1498_s30, 4294967280  ;;  %s17_s22 = sadd.s32 1, %s2217_s22   ;;  %s3057_s15 = smov %s2193_s16 }
 0x3cf   : > { %p14_p8 = scmp.ge.s32.totalorder %s17_s22, 6   ;;  %s3058_s16 = smov %s2197_s17 }
 0x3d0   : > { %s3059_s17 = smov %s2323_s5  ;;  %s3060_s18 = smov %s2209_s20 }
 0x3d1   : > { %s3061_s19 = smov %s2213_s21  ;;  %s3062_s20 = smov %s3065_s25 }
 0x3d2   : > { %s3063_s21 = smov %s3069_s26  ;;  %16 = sbr.rel (!%p14_p8) target bundleno = 5 (0x5), region = 80 }
 0x3d9   :  { %1502 = vsyncpa [#allocation5], 1 }
 0x3da   :  { %1504 = vsyncpa [#allocation5 + $0x1], 1 }

</bundles_post_ra>
